<compile_context>
chip_gen: v7x
topology: tpu7x:2x2x1
jax: 0.10.0
libtpu: 0.0.40
codegen_flags: <defaults>
</compile_context>

<pallas_src>
import jax
import jax.numpy as jnp
from jax.experimental import pallas as pl
from jax.experimental.pallas import tpu as pltpu

_HIDDEN = 128       # 64 (state branch) + 32 (action branch) + 32 zero-pad lanes
_FMA_MAX_K = 16     # below this contraction depth, use VPU FMAs instead of MXU
_CHUNK = 128        # rows per register-resident inner chunk (multiple of 128)


def _round_up(x, m):
    return (x + m - 1) // m * m


def _make_critic_kernel(d, chunk):
    """Kernel factory. d = state_dim + action_dim, chunk = inner row-chunk."""

    def kernel(x_ref, w_ref, b1_ref, w3_ref, b3_ref, o_ref):
        tb = x_ref.shape[0]
        n_chunks = tb // chunk

        # ---- Hoisted loop-invariant weights (loaded once per grid step) ----
        b1 = b1_ref[...]                   # (1, 128) fused bias
        w3c = w3_ref[...]                  # (128, 1) fc3 weights as a column
        b3 = b3_ref[...]                   # (1, 1)
        use_fma = d <= _FMA_MAX_K
        if use_fma:
            w_rows = [w_ref[k:k + 1, :] for k in range(d)]   # d x (1, 128)
        else:
            w_all = w_ref[...]

        def body(c, carry):
            r0 = pl.multiple_of(c * chunk, chunk)
            xs = x_ref[pl.ds(r0, chunk), :]                  # (chunk, d)

            # Layer 1 (fused fcs1/fca1): tiny-K broadcasted VPU FMAs; the MXU
            # path is only used if the contraction depth is large.
            if use_fma:
                z = b1
                for k in range(d):
                    z = z + xs[:, k:k + 1] * w_rows[k]        # (chunk, 128)
            else:
                z = jnp.dot(xs, w_all,
                            preferred_element_type=jnp.float32) + b1
            h = jnp.maximum(z, 0.0)   # relu(concat) == concat(relu): disjoint lanes

            # fc3 (96 -> 1, zero-padded to 128): transpose so rows land on
            # lanes (XLU, otherwise idle), multiply by the w3 column (VPU) and
            # reduce over sublanes -> exact-f32, lane-dense (1, chunk) result.
            hT = h.T                                          # (128, chunk)
            q = jnp.sum(hT * w3c, axis=0, keepdims=True) + b3  # (1, chunk)
            o_ref[:, pl.ds(r0, chunk)] = q.astype(o_ref.dtype)
            return carry

        # Divisibility-safe unroll so the scheduler sees a large basic block.
        if n_chunks <= 8:
            unroll = True
        elif n_chunks % 8 == 0:
            unroll = 8
        elif n_chunks % 4 == 0:
            unroll = 4
        elif n_chunks % 2 == 0:
            unroll = 2
        else:
            unroll = 1
        jax.lax.fori_loop(0, n_chunks, body, None, unroll=unroll)

    return kernel


def simple_critic_forward(state, action, params, *, block_b=4096):
    """state: (B, state_dim) f32, action: (B, action_dim) f32 -> (B, 1) f32."""
    w_cat, b1_pad, w3_pad, b3_pad = params
    B, state_dim = state.shape
    Ba, action_dim = action.shape
    assert B == Ba, (B, Ba)
    d = state_dim + action_dim
    assert w_cat.shape == (d, _HIDDEN), w_cat.shape

    # One concatenated input stream -> one DMA per grid step.
    x = jnp.concatenate([state, action], axis=1).astype(jnp.float32)

    # Batch tile: multiple of the inner chunk so the chunk loop and the
    # lane-dense output tiling both divide evenly.
    tb = _round_up(min(block_b, _round_up(B, _CHUNK)), _CHUNK)
    b_pad = _round_up(B, tb)
    if b_pad != B:
        x = jnp.pad(x, ((0, b_pad - B), (0, 0)))

    grid = (b_pad // tb,)

    flops = 2 * b_pad * (state_dim * 64 + action_dim * 32 + 96)
    bytes_accessed = 4 * (b_pad * (d + 1) + w_cat.size + b1_pad.size
                          + w3_pad.size + b3_pad.size)

    out = pl.pallas_call(
        _make_critic_kernel(d, _CHUNK),
        # Lane-dense (1, b_pad) output: contiguous HBM writeback, no masked
        # (·,1) column stores, no 128x-padded output block in VMEM.
        out_shape=jax.ShapeDtypeStruct((1, b_pad), jnp.float32),
        grid=grid,
        in_specs=[
            # streamed per batch tile
            pl.BlockSpec((tb, d), lambda i: (i, 0)),
            # weights/biases: same block every step -> VMEM-resident, no re-DMA
            pl.BlockSpec((d, _HIDDEN), lambda i: (0, 0)),
            pl.BlockSpec((1, _HIDDEN), lambda i: (0, 0)),
            pl.BlockSpec((_HIDDEN, 1), lambda i: (0, 0)),
            pl.BlockSpec((1, 1), lambda i: (0, 0)),
        ],
        out_specs=pl.BlockSpec((1, tb), lambda i: (0, i)),
        compiler_params=pltpu.CompilerParams(
            # TODO(synk): on v7x confirm the batch axis is split across both
            # TensorCores; if not, switch this axis to pltpu.CORE_PARALLEL.
            dimension_semantics=("parallel",),
            vmem_limit_bytes=32 * 1024 * 1024,   # safe on all generations
        ),
        cost_estimate=pl.CostEstimate(
            flops=flops, transcendentals=0, bytes_accessed=bytes_accessed),
    )(x, w_cat, b1_pad, w3_pad, b3_pad)

    # (1, b_pad) -> (b_pad, 1) is a free metadata reshape; drop padded rows.
    return out.reshape(b_pad, 1)[:B]


def init_params(key, state_dim, action_dim):
    """torch.nn.Linear-style U(-1/sqrt(fan_in), 1/sqrt(fan_in)) init.

    Returns (padded_params_for_kernel, raw_params_for_reference).
    Kernel layout: stacked (sd+ad, 128) weight, (1,128) fused bias,
    (128,1) fc3 column, (1,1) fc3 bias.
    """
    def linear_init(k, fan_in, fan_out):
        kw, kb = jax.random.split(k)
        bound = 1.0 / jnp.sqrt(float(fan_in))
        w = jax.random.uniform(kw, (fan_in, fan_out), jnp.float32, -bound, bound)
        b = jax.random.uniform(kb, (fan_out,), jnp.float32, -bound, bound)
        return w, b

    ks, ka, k3 = jax.random.split(key, 3)
    ws, bs = linear_init(ks, state_dim, 64)    # fcs1
    wa, ba = linear_init(ka, action_dim, 32)   # fca1
    w3, b3 = linear_init(k3, 96, 1)            # fc3

    d = state_dim + action_dim
    w_cat = (jnp.zeros((d, _HIDDEN), jnp.float32)
             .at[:state_dim, :64].set(ws)
             .at[state_dim:, 64:96].set(wa))
    b1_pad = (jnp.zeros((1, _HIDDEN), jnp.float32)
              .at[0, :64].set(bs).at[0, 64:96].set(ba))
    w3_pad = jnp.zeros((_HIDDEN, 1), jnp.float32).at[:96, 0].set(w3[:, 0])
    b3_pad = b3.reshape(1, 1)

    padded = (w_cat, b1_pad, w3_pad, b3_pad)
    raw = (ws, bs, wa, ba, w3, b3)
    return padded, raw


def reference_forward(state, action, raw):
    """Plain-JAX reference mirroring the torch forward exactly."""
    ws, bs, wa, ba, w3, b3 = raw
    s1 = jax.nn.relu(state @ ws + bs)
    a1 = jax.nn.relu(action @ wa + ba)
    x = jnp.concatenate([s1, a1], axis=1)
    return x @ w3 + b3


if __name__ == "__main__":
    key = jax.random.PRNGKey(0)
    k_params, k_s, k_a, k_s2, k_a2 = jax.random.split(key, 5)

    state_dim, action_dim, batch = 8, 4, 8
    params, raw = init_params(k_params, state_dim, action_dim)

    # Small primary test.
    state = jax.random.normal(k_s, (batch, state_dim), dtype=jnp.float32)
    action = jax.random.normal(k_a, (batch, action_dim), dtype=jnp.float32)
    q = simple_critic_forward(state, action, params)
    q = jax.block_until_ready(q)
    q_ref = reference_forward(state, action, raw)
    assert q.shape == (batch, 1), q.shape
    assert jnp.allclose(q, q_ref, atol=1e-5, rtol=1e-5), "mismatch vs JAX reference"

    # Secondary test: non-multiple-of-128 batch -> exercises row padding and
    # the multi-chunk inner loop.
    batch2 = 300
    state2 = jax.random.normal(k_s2, (batch2, state_dim), dtype=jnp.float32)
    action2 = jax.random.normal(k_a2, (batch2, action_dim), dtype=jnp.float32)
    q2 = jax.block_until_ready(simple_critic_forward(state2, action2, params))
    q2_ref = reference_forward(state2, action2, raw)
    assert q2.shape == (batch2, 1), q2.shape
    assert jnp.allclose(q2, q2_ref, atol=1e-5, rtol=1e-5), "mismatch (padded batch)"

    print("KERNEL_OK")
</pallas_src>

<mosaic_0001>
module attributes {stable_mosaic.version = 11 : i64} {
  func.func @kernel(%arg0: i32, %arg1: memref<128x12xf32, #tpu.memory_space<vmem>>, %arg2: memref<12x128xf32, #tpu.memory_space<vmem>>, %arg3: memref<1x128xf32, #tpu.memory_space<vmem>>, %arg4: memref<128x1xf32, #tpu.memory_space<vmem>>, %arg5: memref<1x1xf32, #tpu.memory_space<vmem>>, %arg6: memref<1x128xf32, #tpu.memory_space<vmem>>) attributes {dimension_semantics = [#tpu.dimension_semantics<parallel>], iteration_bounds = array<i64: 1>, scalar_prefetch = 0 : i64, scratch_operands = 0 : i64, tpu.core_type = #tpu.core_type<tc>, window_params = [{transform_indices = @transform_0, window_bounds = array<i64: 128, 12>}, {pipeline_mode = #tpu.pipeline_mode<synchronous>, transform_indices = @transform_1, window_bounds = array<i64: 12, 128>}, {pipeline_mode = #tpu.pipeline_mode<synchronous>, transform_indices = @transform_2, window_bounds = array<i64: 1, 128>}, {pipeline_mode = #tpu.pipeline_mode<synchronous>, transform_indices = @transform_3, window_bounds = array<i64: 128, 1>}, {pipeline_mode = #tpu.pipeline_mode<synchronous>, transform_indices = @transform_4, window_bounds = array<i64: 1, 1>}, {transform_indices = @transform_5, window_bounds = array<i64: 1, 128>}]} {
    %c0 = arith.constant 0 : index
    %c0_0 = arith.constant 0 : index
    %0 = vector.load %arg3[%c0, %c0_0] : memref<1x128xf32, #tpu.memory_space<vmem>>, vector<1x128xf32>
    %c0_1 = arith.constant 0 : index
    %c0_2 = arith.constant 0 : index
    %1 = vector.load %arg4[%c0_1, %c0_2] : memref<128x1xf32, #tpu.memory_space<vmem>>, vector<128x1xf32>
    %c0_3 = arith.constant 0 : index
    %c0_4 = arith.constant 0 : index
    %2 = vector.load %arg5[%c0_3, %c0_4] : memref<1x1xf32, #tpu.memory_space<vmem>>, vector<1x1xf32>
    %c0_5 = arith.constant 0 : index
    %c0_6 = arith.constant 0 : index
    %3 = vector.load %arg2[%c0_5, %c0_6] : memref<12x128xf32, #tpu.memory_space<vmem>>, vector<1x128xf32>
    %c1 = arith.constant 1 : index
    %c0_7 = arith.constant 0 : index
    %4 = vector.load %arg2[%c1, %c0_7] : memref<12x128xf32, #tpu.memory_space<vmem>>, vector<1x128xf32>
    %c2 = arith.constant 2 : index
    %c0_8 = arith.constant 0 : index
    %5 = vector.load %arg2[%c2, %c0_8] : memref<12x128xf32, #tpu.memory_space<vmem>>, vector<1x128xf32>
    %c3 = arith.constant 3 : index
    %c0_9 = arith.constant 0 : index
    %6 = vector.load %arg2[%c3, %c0_9] : memref<12x128xf32, #tpu.memory_space<vmem>>, vector<1x128xf32>
    %c4 = arith.constant 4 : index
    %c0_10 = arith.constant 0 : index
    %7 = vector.load %arg2[%c4, %c0_10] : memref<12x128xf32, #tpu.memory_space<vmem>>, vector<1x128xf32>
    %c5 = arith.constant 5 : index
    %c0_11 = arith.constant 0 : index
    %8 = vector.load %arg2[%c5, %c0_11] : memref<12x128xf32, #tpu.memory_space<vmem>>, vector<1x128xf32>
    %c6 = arith.constant 6 : index
    %c0_12 = arith.constant 0 : index
    %9 = vector.load %arg2[%c6, %c0_12] : memref<12x128xf32, #tpu.memory_space<vmem>>, vector<1x128xf32>
    %c7 = arith.constant 7 : index
    %c0_13 = arith.constant 0 : index
    %10 = vector.load %arg2[%c7, %c0_13] : memref<12x128xf32, #tpu.memory_space<vmem>>, vector<1x128xf32>
    %c8 = arith.constant 8 : index
    %c0_14 = arith.constant 0 : index
    %11 = vector.load %arg2[%c8, %c0_14] : memref<12x128xf32, #tpu.memory_space<vmem>>, vector<1x128xf32>
    %c9 = arith.constant 9 : index
    %c0_15 = arith.constant 0 : index
    %12 = vector.load %arg2[%c9, %c0_15] : memref<12x128xf32, #tpu.memory_space<vmem>>, vector<1x128xf32>
    %c10 = arith.constant 10 : index
    %c0_16 = arith.constant 0 : index
    %13 = vector.load %arg2[%c10, %c0_16] : memref<12x128xf32, #tpu.memory_space<vmem>>, vector<1x128xf32>
    %c11 = arith.constant 11 : index
    %c0_17 = arith.constant 0 : index
    %14 = vector.load %arg2[%c11, %c0_17] : memref<12x128xf32, #tpu.memory_space<vmem>>, vector<1x128xf32>
    %c0_i32 = arith.constant 0 : i32
    %c128_i32 = arith.constant 128 : i32
    %15 = arith.muli %c0_i32, %c128_i32 : i32
    %16 = tpu.assume_multiple %15, 128 : i32
    %17 = arith.index_cast %16 : i32 to index
    %c0_18 = arith.constant 0 : index
    %18 = vector.load %arg1[%17, %c0_18] : memref<128x12xf32, #tpu.memory_space<vmem>>, vector<128x12xf32>
    %19 = vector.extract_strided_slice %18 {offsets = [0, 0], sizes = [128, 1], strides = [1, 1]} : vector<128x12xf32> to vector<128x1xf32>
    %20 = vector.broadcast %19 : vector<128x1xf32> to vector<128x128xf32>
    %21 = vector.broadcast %3 : vector<1x128xf32> to vector<128x128xf32>
    %22 = arith.mulf %20, %21 : vector<128x128xf32>
    %23 = vector.broadcast %0 : vector<1x128xf32> to vector<128x128xf32>
    %24 = arith.addf %23, %22 : vector<128x128xf32>
    %25 = vector.extract_strided_slice %18 {offsets = [0, 1], sizes = [128, 1], strides = [1, 1]} : vector<128x12xf32> to vector<128x1xf32>
    %26 = vector.broadcast %25 : vector<128x1xf32> to vector<128x128xf32>
    %27 = vector.broadcast %4 : vector<1x128xf32> to vector<128x128xf32>
    %28 = arith.mulf %26, %27 : vector<128x128xf32>
    %29 = arith.addf %24, %28 : vector<128x128xf32>
    %30 = vector.extract_strided_slice %18 {offsets = [0, 2], sizes = [128, 1], strides = [1, 1]} : vector<128x12xf32> to vector<128x1xf32>
    %31 = vector.broadcast %30 : vector<128x1xf32> to vector<128x128xf32>
    %32 = vector.broadcast %5 : vector<1x128xf32> to vector<128x128xf32>
    %33 = arith.mulf %31, %32 : vector<128x128xf32>
    %34 = arith.addf %29, %33 : vector<128x128xf32>
    %35 = vector.extract_strided_slice %18 {offsets = [0, 3], sizes = [128, 1], strides = [1, 1]} : vector<128x12xf32> to vector<128x1xf32>
    %36 = vector.broadcast %35 : vector<128x1xf32> to vector<128x128xf32>
    %37 = vector.broadcast %6 : vector<1x128xf32> to vector<128x128xf32>
    %38 = arith.mulf %36, %37 : vector<128x128xf32>
    %39 = arith.addf %34, %38 : vector<128x128xf32>
    %40 = vector.extract_strided_slice %18 {offsets = [0, 4], sizes = [128, 1], strides = [1, 1]} : vector<128x12xf32> to vector<128x1xf32>
    %41 = vector.broadcast %40 : vector<128x1xf32> to vector<128x128xf32>
    %42 = vector.broadcast %7 : vector<1x128xf32> to vector<128x128xf32>
    %43 = arith.mulf %41, %42 : vector<128x128xf32>
    %44 = arith.addf %39, %43 : vector<128x128xf32>
    %45 = vector.extract_strided_slice %18 {offsets = [0, 5], sizes = [128, 1], strides = [1, 1]} : vector<128x12xf32> to vector<128x1xf32>
    %46 = vector.broadcast %45 : vector<128x1xf32> to vector<128x128xf32>
    %47 = vector.broadcast %8 : vector<1x128xf32> to vector<128x128xf32>
    %48 = arith.mulf %46, %47 : vector<128x128xf32>
    %49 = arith.addf %44, %48 : vector<128x128xf32>
    %50 = vector.extract_strided_slice %18 {offsets = [0, 6], sizes = [128, 1], strides = [1, 1]} : vector<128x12xf32> to vector<128x1xf32>
    %51 = vector.broadcast %50 : vector<128x1xf32> to vector<128x128xf32>
    %52 = vector.broadcast %9 : vector<1x128xf32> to vector<128x128xf32>
    %53 = arith.mulf %51, %52 : vector<128x128xf32>
    %54 = arith.addf %49, %53 : vector<128x128xf32>
    %55 = vector.extract_strided_slice %18 {offsets = [0, 7], sizes = [128, 1], strides = [1, 1]} : vector<128x12xf32> to vector<128x1xf32>
    %56 = vector.broadcast %55 : vector<128x1xf32> to vector<128x128xf32>
    %57 = vector.broadcast %10 : vector<1x128xf32> to vector<128x128xf32>
    %58 = arith.mulf %56, %57 : vector<128x128xf32>
    %59 = arith.addf %54, %58 : vector<128x128xf32>
    %60 = vector.extract_strided_slice %18 {offsets = [0, 8], sizes = [128, 1], strides = [1, 1]} : vector<128x12xf32> to vector<128x1xf32>
    %61 = vector.broadcast %60 : vector<128x1xf32> to vector<128x128xf32>
    %62 = vector.broadcast %11 : vector<1x128xf32> to vector<128x128xf32>
    %63 = arith.mulf %61, %62 : vector<128x128xf32>
    %64 = arith.addf %59, %63 : vector<128x128xf32>
    %65 = vector.extract_strided_slice %18 {offsets = [0, 9], sizes = [128, 1], strides = [1, 1]} : vector<128x12xf32> to vector<128x1xf32>
    %66 = vector.broadcast %65 : vector<128x1xf32> to vector<128x128xf32>
    %67 = vector.broadcast %12 : vector<1x128xf32> to vector<128x128xf32>
    %68 = arith.mulf %66, %67 : vector<128x128xf32>
    %69 = arith.addf %64, %68 : vector<128x128xf32>
    %70 = vector.extract_strided_slice %18 {offsets = [0, 10], sizes = [128, 1], strides = [1, 1]} : vector<128x12xf32> to vector<128x1xf32>
    %71 = vector.broadcast %70 : vector<128x1xf32> to vector<128x128xf32>
    %72 = vector.broadcast %13 : vector<1x128xf32> to vector<128x128xf32>
    %73 = arith.mulf %71, %72 : vector<128x128xf32>
    %74 = arith.addf %69, %73 : vector<128x128xf32>
    %75 = vector.extract_strided_slice %18 {offsets = [0, 11], sizes = [128, 1], strides = [1, 1]} : vector<128x12xf32> to vector<128x1xf32>
    %76 = vector.broadcast %75 : vector<128x1xf32> to vector<128x128xf32>
    %77 = vector.broadcast %14 : vector<1x128xf32> to vector<128x128xf32>
    %78 = arith.mulf %76, %77 : vector<128x128xf32>
    %79 = arith.addf %74, %78 : vector<128x128xf32>
    %cst = arith.constant 0.000000e+00 : f32
    %80 = vector.broadcast %cst : f32 to vector<128x128xf32>
    %81 = arith.maximumf %79, %80 : vector<128x128xf32>
    %82 = tpu.transpose %81, [1, 0] : vector<128x128xf32> -> vector<128x128xf32>
    %83 = vector.broadcast %1 : vector<128x1xf32> to vector<128x128xf32>
    %84 = arith.mulf %82, %83 : vector<128x128xf32>
    %cst_19 = arith.constant dense<0.000000e+00> : vector<128xf32>
    %85 = vector.multi_reduction <add>, %84, %cst_19 [0] : vector<128x128xf32> to vector<128xf32>
    %86 = vector.shape_cast %85 : vector<128xf32> to vector<1x128xf32>
    %87 = vector.broadcast %2 : vector<1x1xf32> to vector<1x128xf32>
    %88 = arith.addf %86, %87 : vector<1x128xf32>
    %c0_20 = arith.constant 0 : index
    %89 = arith.index_cast %16 : i32 to index
    %90 = vector.load %arg6[%c0_20, %89] : memref<1x128xf32, #tpu.memory_space<vmem>>, vector<1x128xf32>
    tpu.vector_store %arg6[%c0_20, %89], %88 {strides = array<i32>} : memref<1x128xf32, #tpu.memory_space<vmem>>, vector<1x128xf32>,
    %c1_i32 = arith.constant 1 : i32
    return
  }
  func.func @transform_0(%arg0: i32) -> (i32, i32) {
    %c0_i32 = arith.constant 0 : i32
    %c0_i32_0 = arith.constant 0 : i32
    return %arg0, %c0_i32 : i32, i32
  }
  func.func @transform_1(%arg0: i32) -> (i32, i32) {
    %c0_i32 = arith.constant 0 : i32
    %c0_i32_0 = arith.constant 0 : i32
    %c0_i32_1 = arith.constant 0 : i32
    return %c0_i32, %c0_i32_0 : i32, i32
  }
  func.func @transform_2(%arg0: i32) -> (i32, i32) {
    %c0_i32 = arith.constant 0 : i32
    %c0_i32_0 = arith.constant 0 : i32
    %c0_i32_1 = arith.constant 0 : i32
    return %c0_i32, %c0_i32_0 : i32, i32
  }
  func.func @transform_3(%arg0: i32) -> (i32, i32) {
    %c0_i32 = arith.constant 0 : i32
    %c0_i32_0 = arith.constant 0 : i32
    %c0_i32_1 = arith.constant 0 : i32
    return %c0_i32, %c0_i32_0 : i32, i32
  }
  func.func @transform_4(%arg0: i32) -> (i32, i32) {
    %c0_i32 = arith.constant 0 : i32
    %c0_i32_0 = arith.constant 0 : i32
    %c0_i32_1 = arith.constant 0 : i32
    return %c0_i32, %c0_i32_0 : i32, i32
  }
  func.func @transform_5(%arg0: i32) -> (i32, i32) {
    %c0_i32 = arith.constant 0 : i32
    %c0_i32_0 = arith.constant 0 : i32
    return %c0_i32, %arg0 : i32, i32
  }
}

</mosaic_0001>

<bundles_post_ra>
// kernel: tpu_custom_call.1
= control target key start
LH: loop header
LB: loop body
LE: loop exit
PB: predicated region body
PF: predicated region fallthrough
CT: control target
= control target key end

     0   :  { %s2599_s0 = inlined_call_operand.vmem [shape: f32[128,12], index: 0, kind: input, shape index: {}]   ;;  %s2600_s1 = inlined_call_operand.vmem [shape: f32[12,128], index: 1, kind: input, shape index: {}]   ;;  %s2601_s2 = inlined_call_operand.vmem [shape: f32[1,128], index: 2, kind: input, shape index: {}]   ;;  %s2602_s3 = inlined_call_operand.vmem [shape: f32[128,1], index: 3, kind: input, shape index: {}]   ;;  %s2603_s4 = inlined_call_operand.<no memory space> [shape: f32[1,1], index: 4, kind: input, shape index: {}]   ;;  %s2604_s5 = inlined_call_operand.hbm [shape: f32[1,128], index: 5, kind: output, shape index: {}]  }
   0x1   :  { %v10_v0 = vstv %s2603_s4 }
   0x2   :  { %11 = vst [vmem:[#allocation2] sm:$0x1] %v10_v0 }
   0x3   :  { %v1617_v1 = vld [vmem:[%s2599_s0 + $0x10] sm:$0xff]  ;;  %v1622_v2 = vld [vmem:[%s2599_s0] sm:$0xff]  ;;  %v2605_v3 = vmov 0   ;;  %v1631_v4 = vld [vmem:[%s2599_s0 + $0x18] sm:$0xff] }
   0x4   :  { %1508 = vset.pattern.permute.xlu1 %v2605_v3  ;;  %1507 = vset.pattern.permute.xlu0 %v2605_v3  ;;  %v1636_v5 = vld [vmem:[%s2599_s0 + $0x8] sm:$0xff] }
   0x5   :  { %81 = vperm.xlu1 %1508, %v1617_v1   ;;  %71 = vperm.xlu0 %1507, %v1622_v2  }
   0x9   :  { %86 = vperm.xlu1 %1508, %v1631_v4   ;;  %76 = vperm.xlu0 %1507, %v1636_v5  }
   0xa   :  { %12 = vsyncpa [#allocation4], 0  ;;  %v1643_v6 = vld [vmem:[%s2599_s0 + $0x28] sm:$0xff]  ;;  %v1648_v7 = vld [vmem:[%s2599_s0 + $0x20] sm:$0xff]  ;;  %v1569_v18 = vmov 1   ;;  %v1570_v19 = vmov 2  }
   0xb   :  { %v1655_v8 = vld [vmem:[%s2599_s0 + $0x38] sm:$0xff]  ;;  %v1660_v9 = vld [vmem:[%s2599_s0 + $0x30] sm:$0xff]  ;;  %v1667_v10 = vld [vmem:[%s2599_s0 + $0x48] sm:$0xff]  ;;  %v1571_v20 = vmov 3   ;;  %v1572_v22 = vmov 4   ;;  %v1573_v51 = vmov 5  }
   0xc   :  { %v1672_v11 = vld [vmem:[%s2599_s0 + $0x40] sm:$0xff]  ;;  %v1679_v12 = vld [vmem:[%s2599_s0 + $0x58] sm:$0xff]  ;;  %v1684_v13 = vld [vmem:[%s2599_s0 + $0x50] sm:$0xff] }
   0xd   :  { %96 = vperm.xlu1 %1508, %v1643_v6   ;;  %91 = vperm.xlu0 %1507, %v1648_v7   ;;  %v1691_v14 = vld [vmem:[%s2599_s0 + $0x68] sm:$0xff]  ;;  %v1696_v15 = vld [vmem:[%s2599_s0 + $0x60] sm:$0xff]  ;;  %v1703_v16 = vld [vmem:[%s2599_s0 + $0x78] sm:$0xff] }
   0xe   :  { %v1708_v17 = vld [vmem:[%s2599_s0 + $0x70] sm:$0xff]  ;;  %v1785_v30 = vld [vmem:[%s2600_s1] ss:$0 sm:$0xff]  ;;  %v1843_v63 = vld [vmem:[%s2600_s1 + $0x1] ss:$0 sm:$0xff] }
   0xf   :  { %v1795_v34 = vld [vmem:[%s2601_s2] ss:$0 sm:$0xff] }
  0x11   :  { %106 = vperm.xlu1 %1508, %v1655_v8   ;;  %101 = vperm.xlu0 %1507, %v1660_v9  }
  0x15   :  { %116 = vperm.xlu1 %1508, %v1667_v10   ;;  %111 = vperm.xlu0 %1507, %v1672_v11  }
  0x19   :  { %126 = vperm.xlu1 %1508, %v1679_v12   ;;  %121 = vperm.xlu0 %1507, %v1684_v13  }
  0x1d   :  { %136 = vperm.xlu1 %1508, %v1691_v14   ;;  %131 = vperm.xlu0 %1507, %v1696_v15  }
  0x21   :  { %146 = vperm.xlu1 %1508, %v1703_v16   ;;  %141 = vperm.xlu0 %1507, %v1708_v17  }
  0x25   :  { %1510 = vset.pattern.permute.xlu1 %v1569_v18  ;;  %1509 = vset.pattern.permute.xlu0 %v1569_v18 }
  0x26   :  { %196 = vperm.xlu1 %1510, %v1636_v5   ;;  %192 = vperm.xlu0 %1509, %v1622_v2  }
  0x2a   :  { %200 = vperm.xlu1 %1510, %v1617_v1   ;;  %204 = vperm.xlu0 %1509, %v1631_v4  }
  0x2e   :  { %208 = vperm.xlu1 %1510, %v1648_v7   ;;  %212 = vperm.xlu0 %1509, %v1643_v6  }
  0x32   :  { %216 = vperm.xlu1 %1510, %v1660_v9   ;;  %220 = vperm.xlu0 %1509, %v1655_v8  }
  0x36   :  { %224 = vperm.xlu1 %1510, %v1672_v11   ;;  %228 = vperm.xlu0 %1509, %v1667_v10  }
  0x3a   :  { %232 = vperm.xlu1 %1510, %v1684_v13   ;;  %236 = vperm.xlu0 %1509, %v1679_v12  }
  0x3e   :  { %240 = vperm.xlu1 %1510, %v1696_v15   ;;  %244 = vperm.xlu0 %1509, %v1691_v14  }
  0x42   :  { %248 = vperm.xlu1 %1510, %v1708_v17   ;;  %252 = vperm.xlu0 %1509, %v1703_v16  }
  0x46   :  { %1511 = vset.pattern.permute.xlu1 %v1570_v19  ;;  %1512 = vset.pattern.permute.xlu0 %v1570_v19 }
  0x47   :  { %292 = vperm.xlu1 %1511, %v1622_v2   ;;  %296 = vperm.xlu0 %1512, %v1636_v5  }
  0x4b   :  { %300 = vperm.xlu1 %1511, %v1617_v1   ;;  %308 = vperm.xlu0 %1512, %v1648_v7  }
  0x4f   :  { %304 = vperm.xlu1 %1511, %v1631_v4   ;;  %316 = vperm.xlu0 %1512, %v1660_v9  }
  0x53   :  { %312 = vperm.xlu1 %1511, %v1643_v6   ;;  %324 = vperm.xlu0 %1512, %v1672_v11  }
  0x57   :  { %320 = vperm.xlu1 %1511, %v1655_v8   ;;  %332 = vperm.xlu0 %1512, %v1684_v13  }
  0x5b   :  { %328 = vperm.xlu1 %1511, %v1667_v10   ;;  %340 = vperm.xlu0 %1512, %v1696_v15  }
  0x5f   :  { %336 = vperm.xlu1 %1511, %v1679_v12   ;;  %348 = vperm.xlu0 %1512, %v1708_v17  }
  0x63   :  { %344 = vperm.xlu1 %1511, %v1691_v14   ;;  %1513 = vset.pattern.permute.xlu0 %v1571_v20 }
  0x64   :  { %392 = vperm.xlu0 %1513, %v1622_v2  }
  0x67   :  { %352 = vperm.xlu1 %1511, %v1703_v16  }
  0x68   :  { %404 = vperm.xlu0 %1513, %v1631_v4  }
  0x6b   :  { %1514 = vset.pattern.permute.xlu1 %v1571_v20 }
  0x6c   :  { %396 = vperm.xlu1 %1514, %v1636_v5   ;;  %412 = vperm.xlu0 %1513, %v1643_v6  }
  0x70   :  { %400 = vperm.xlu1 %1514, %v1617_v1   ;;  %420 = vperm.xlu0 %1513, %v1655_v8  }
  0x74   :  { %408 = vperm.xlu1 %1514, %v1648_v7   ;;  %428 = vperm.xlu0 %1513, %v1667_v10  }
  0x78   :  { %416 = vperm.xlu1 %1514, %v1660_v9   ;;  %436 = vperm.xlu0 %1513, %v1679_v12  }
  0x7c   :  { %424 = vperm.xlu1 %1514, %v1672_v11   ;;  %444 = vperm.xlu0 %1513, %v1691_v14  }
  0x80   :  { %432 = vperm.xlu1 %1514, %v1684_v13   ;;  %452 = vperm.xlu0 %1513, %v1703_v16  }
  0x84   :  { %v1758_v21 = vpop.permute.xlu1 %81  ;;  %440 = vperm.xlu1 %1514, %v1696_v15   ;;  %1516 = vset.pattern.permute.xlu0 %v1572_v22  ;;  %v1761_v23 = vpop.permute.xlu0 %71 }
  0x85   :  { %2607 = vst [vmem:[#allocation6_spill] sm:$0xff] %v1758_v21  ;;  %2608 = vst [vmem:[#allocation7_spill] sm:$0xff] %v1761_v23  ;;  %496 = vperm.xlu0 %1516, %v1636_v5  }
  0x88   :  { %v1764_v24 = vpop.permute.xlu1 %86  ;;  %448 = vperm.xlu1 %1514, %v1708_v17   ;;  %v1767_v25 = vpop.permute.xlu0 %76 }
  0x89   :  { %2609 = vst [vmem:[#allocation8_spill] sm:$0xff] %v1764_v24  ;;  %508 = vperm.xlu0 %1516, %v1648_v7  }
  0x8c   :  { %v1770_v26 = vpop.permute.xlu1 %96  ;;  %1515 = vset.pattern.permute.xlu1 %v1572_v22  ;;  %v1772_v27 = vpop.permute.xlu0 %91 }
  0x8d   :  { %2610 = vst [vmem:[#allocation9_spill] sm:$0xff] %v1770_v26  ;;  %492 = vperm.xlu1 %1515, %v1622_v2   ;;  %516 = vperm.xlu0 %1516, %v1660_v9  }
  0x90   :  { %v1776_v28 = vpop.permute.xlu1 %106  ;;  %v1778_v29 = vpop.permute.xlu0 %101 }
  0x91   :  { %2611 = vst [vmem:[#allocation10_spill] sm:$0xff] %v1776_v28  ;;  %500 = vperm.xlu1 %1515, %v1617_v1   ;;  %524 = vperm.xlu0 %1516, %v1672_v11  }
  0x94   :  { %v117_v31 = vpop.permute.xlu1 %116  ;;  %v1787_v32 = vpop.permute.xlu0 %111 }
  0x95   :  { %v162_v33 = vmul.f32 %v1785_v30, %v117_v31  ;;  %504 = vperm.xlu1 %1515, %v1631_v4   ;;  %532 = vperm.xlu0 %1516, %v1684_v13  }
  0x97   :  { %v184_v35 = vadd.f32 %v1795_v34, %v162_v33 }
  0x98   :  { %v127_v36 = vpop.permute.xlu1 %126  ;;  %v122_v37 = vpop.permute.xlu0 %121 }
  0x99   :  { %v164_v38 = vmul.f32 %v1785_v30, %v127_v36  ;;  %512 = vperm.xlu1 %1515, %v1643_v6   ;;  %540 = vperm.xlu0 %1516, %v1696_v15   ;;  %v163_v39 = vmul.f32 %v1785_v30, %v122_v37 }
  0x9b   :  { %v186_v40 = vadd.f32 %v1795_v34, %v164_v38  ;;  %v185_v41 = vadd.f32 %v1795_v34, %v163_v39 }
  0x9c   :  { %v137_v42 = vpop.permute.xlu1 %136  ;;  %v132_v43 = vpop.permute.xlu0 %131 }
  0x9d   :  { %v166_v44 = vmul.f32 %v1785_v30, %v137_v42  ;;  %520 = vperm.xlu1 %1515, %v1655_v8   ;;  %548 = vperm.xlu0 %1516, %v1708_v17   ;;  %v165_v45 = vmul.f32 %v1785_v30, %v132_v43 }
  0x9f   :  { %v188_v46 = vadd.f32 %v1795_v34, %v166_v44  ;;  %v187_v47 = vadd.f32 %v1795_v34, %v165_v45 }
  0xa0   :  { %v147_v48 = vpop.permute.xlu1 %146  ;;  %v142_v49 = vpop.permute.xlu0 %141 }
  0xa1   :  { %v168_v50 = vmul.f32 %v1785_v30, %v147_v48  ;;  %528 = vperm.xlu1 %1515, %v1667_v10   ;;  %1517 = vset.pattern.permute.xlu0 %v1573_v51  ;;  %v167_v52 = vmul.f32 %v1785_v30, %v142_v49 }
  0xa2   :  { %592 = vperm.xlu0 %1517, %v1622_v2  }
  0xa3   :  { %v190_v53 = vadd.f32 %v1795_v34, %v168_v50  ;;  %v189_v54 = vadd.f32 %v1795_v34, %v167_v52 }
  0xa5   :  { %v1816_v55 = vpop.permute.xlu1 %196  ;;  %536 = vperm.xlu1 %1515, %v1679_v12   ;;  %v1819_v56 = vpop.permute.xlu0 %192 }
  0xa6   :  { %2612 = vst [vmem:[#allocation11_spill] sm:$0xff] %v1819_v56  ;;  %604 = vperm.xlu0 %1517, %v1631_v4  }
  0xa9   :  { %v1822_v57 = vpop.permute.xlu1 %200  ;;  %544 = vperm.xlu1 %1515, %v1691_v14   ;;  %v1825_v58 = vpop.permute.xlu0 %204 }
  0xaa   :  { %2613 = vst [vmem:[#allocation12_spill] sm:$0xff] %v1822_v57  ;;  %2614 = vst [vmem:[#allocation13_spill] sm:$0xff] %v1825_v58  ;;  %612 = vperm.xlu0 %1517, %v1643_v6  }
  0xad   :  { %v1828_v59 = vpop.permute.xlu1 %208  ;;  %552 = vperm.xlu1 %1515, %v1703_v16   ;;  %v1831_v60 = vpop.permute.xlu0 %212 }
  0xae   :  { %2615 = vst [vmem:[#allocation14_spill] sm:$0xff] %v1831_v60  ;;  %620 = vperm.xlu0 %1517, %v1655_v8  }
  0xb1   :  { %v1834_v61 = vpop.permute.xlu1 %216  ;;  %1518 = vset.pattern.permute.xlu1 %v1573_v51  ;;  %v1836_v62 = vpop.permute.xlu0 %220 }
  0xb2   :  { %2616 = vst [vmem:[#allocation15_spill] sm:$0xff] %v1836_v62  ;;  %596 = vperm.xlu1 %1518, %v1636_v5   ;;  %628 = vperm.xlu0 %1517, %v1667_v10  }
  0xb5   :  { %v1845_v0 = vpop.permute.xlu1 %224  ;;  %v229_v18 = vpop.permute.xlu0 %228 }
  0xb6   :  { %v268_v19 = vmul.f32 %v1843_v63, %v229_v18  ;;  %600 = vperm.xlu1 %1518, %v1617_v1   ;;  %636 = vperm.xlu0 %1517, %v1679_v12  }
  0xb8   :  { %v284_v20 = vadd.f32 %v268_v19, %v184_v35 }
  0xb9   :  { %v233_v22 = vpop.permute.xlu1 %232  ;;  %v237_v31 = vpop.permute.xlu0 %236 }
  0xba   :  { %v269_v33 = vmul.f32 %v1843_v63, %v233_v22  ;;  %v270_v36 = vmul.f32 %v1843_v63, %v237_v31  ;;  %608 = vperm.xlu1 %1518, %v1648_v7   ;;  %644 = vperm.xlu0 %1517, %v1691_v14  }
  0xbc   :  { %v285_v37 = vadd.f32 %v269_v33, %v185_v41  ;;  %v286_v38 = vadd.f32 %v270_v36, %v186_v40  ;;  %v1574_v40 = vmov 6   ;;  %v1889_v33 = vld [vmem:[%s2600_s1 + $0x2] ss:$0 sm:$0xff] }
  0xbd   :  { %v241_v39 = vpop.permute.xlu1 %240  ;;  %v245_v42 = vpop.permute.xlu0 %244 }
  0xbe   :  { %v271_v43 = vmul.f32 %v1843_v63, %v241_v39  ;;  %v272_v44 = vmul.f32 %v1843_v63, %v245_v42  ;;  %616 = vperm.xlu1 %1518, %v1660_v9   ;;  %652 = vperm.xlu0 %1517, %v1703_v16  }
  0xc0   :  { %v287_v35 = vadd.f32 %v271_v43, %v187_v47  ;;  %v288_v45 = vadd.f32 %v272_v44, %v188_v46 }
  0xc1   :  { %v249_v48 = vpop.permute.xlu1 %248  ;;  %v253_v49 = vpop.permute.xlu0 %252 }
  0xc2   :  { %v273_v50 = vmul.f32 %v1843_v63, %v249_v48  ;;  %v274_v51 = vmul.f32 %v1843_v63, %v253_v49  ;;  %624 = vperm.xlu1 %1518, %v1672_v11   ;;  %1520 = vset.pattern.permute.xlu0 %v1574_v40 }
  0xc3   :  { %696 = vperm.xlu0 %1520, %v1636_v5  }
  0xc4   :  { %v289_v41 = vadd.f32 %v273_v50, %v189_v54  ;;  %v290_v52 = vadd.f32 %v274_v51, %v190_v53 }
  0xc6   :  { %632 = vperm.xlu1 %1518, %v1684_v13   ;;  %v1863_v18 = vpop.permute.xlu1 %292  ;;  %v1865_v47 = vpop.permute.xlu0 %296 }
  0xc7   :  { %2617 = vst [vmem:[#allocation16_spill] sm:$0xff] %v1863_v18  ;;  %708 = vperm.xlu0 %1520, %v1648_v7  }
  0xca   :  { %640 = vperm.xlu1 %1518, %v1696_v15   ;;  %v1869_v46 = vpop.permute.xlu1 %300  ;;  %v1871_v19 = vpop.permute.xlu0 %308 }
  0xcb   :  { %2618 = vst [vmem:[#allocation17_spill] sm:$0xff] %v1869_v46  ;;  %716 = vperm.xlu0 %1520, %v1660_v9  }
  0xce   :  { %648 = vperm.xlu1 %1518, %v1708_v17   ;;  %v1875_v54 = vpop.permute.xlu1 %304  ;;  %v1877_v53 = vpop.permute.xlu0 %316 }
  0xcf   :  { %2619 = vst [vmem:[#allocation18_spill] sm:$0xff] %v1875_v54  ;;  %724 = vperm.xlu0 %1520, %v1672_v11  }
  0xd2   :  { %1519 = vset.pattern.permute.xlu1 %v1574_v40  ;;  %v1880_v22 = vpop.permute.xlu1 %312  ;;  %v1882_v31 = vpop.permute.xlu0 %324 }
  0xd3   :  { %2620 = vst [vmem:[#allocation19_spill] sm:$0xff] %v1880_v22  ;;  %692 = vperm.xlu1 %1519, %v1622_v2   ;;  %732 = vperm.xlu0 %1520, %v1684_v13  }
  0xd6   :  { %v1891_v36 = vpop.permute.xlu1 %320  ;;  %v333_v39 = vpop.permute.xlu0 %332 }
  0xd7   :  { %2621 = vst [vmem:[#allocation20_spill] sm:$0xff] %v1891_v36  ;;  %v369_v42 = vmul.f32 %v1889_v33, %v333_v39  ;;  %700 = vperm.xlu1 %1519, %v1617_v1   ;;  %740 = vperm.xlu0 %1520, %v1696_v15  }
  0xd9   :  { %v1896_v43 = vadd.f32 %v369_v42, %v285_v37  ;;  %v1575_v42 = vmov 7  }
  0xda   :  { %v329_v44 = vpop.permute.xlu1 %328  ;;  %v341_v48 = vpop.permute.xlu0 %340 }
  0xdb   :  { %v368_v49 = vmul.f32 %v1889_v33, %v329_v44  ;;  %v371_v50 = vmul.f32 %v1889_v33, %v341_v48  ;;  %704 = vperm.xlu1 %1519, %v1631_v4   ;;  %748 = vperm.xlu0 %1520, %v1708_v17  }
  0xdd   :  { %v384_v51 = vadd.f32 %v368_v49, %v284_v20  ;;  %v1902_v40 = vadd.f32 %v371_v50, %v287_v35 }
  0xde   :  { %v337_v39 = vpop.permute.xlu1 %336  ;;  %v349_v3 = vpop.permute.xlu0 %348 }
  0xdf   :  { %v370_v18 = vmul.f32 %v1889_v33, %v337_v39  ;;  %v373_v37 = vmul.f32 %v1889_v33, %v349_v3  ;;  %712 = vperm.xlu1 %1519, %v1643_v6   ;;  %1521 = vset.pattern.permute.xlu0 %v1575_v42 }
  0xe0   :  { %792 = vperm.xlu0 %1521, %v1622_v2  }
  0xe1   :  { %v386_v44 = vadd.f32 %v370_v18, %v286_v38  ;;  %v389_v48 = vadd.f32 %v373_v37, %v289_v41 }
  0xe2   :  { %v345_v56 = vpop.permute.xlu1 %344 }
  0xe3   :  { %v372_v23 = vmul.f32 %v1889_v33, %v345_v56  ;;  %720 = vperm.xlu1 %1519, %v1655_v8   ;;  %v1910_v20 = vpop.permute.xlu0 %392 }
  0xe4   :  { %2622 = vst [vmem:[#allocation21_spill] sm:$0xff] %v1910_v20  ;;  %804 = vperm.xlu0 %1521, %v1631_v4  }
  0xe5   :  { %v388_v35 = vadd.f32 %v372_v23, %v288_v45 }
  0xe6   :  { %v353_v49 = vpop.permute.xlu1 %352 }
  0xe7   :  { %v374_v3 = vmul.f32 %v1889_v33, %v353_v49  ;;  %728 = vperm.xlu1 %1519, %v1667_v10   ;;  %v1915_v50 = vpop.permute.xlu0 %404 }
  0xe8   :  { %2623 = vst [vmem:[#allocation22_spill] sm:$0xff] %v1915_v50  ;;  %812 = vperm.xlu0 %1521, %v1643_v6  }
  0xe9   :  { %v390_v38 = vadd.f32 %v374_v3, %v290_v52  ;;  %v1933_v52 = vld [vmem:[%s2600_s1 + $0x3] ss:$0 sm:$0xff] }
  0xeb   :  { %736 = vperm.xlu1 %1519, %v1679_v12   ;;  %v1919_v56 = vpop.permute.xlu1 %396  ;;  %v1921_v41 = vpop.permute.xlu0 %412 }
  0xec   :  { %2624 = vst [vmem:[#allocation23_spill] sm:$0xff] %v1921_v41  ;;  %820 = vperm.xlu0 %1521, %v1655_v8  }
  0xef   :  { %744 = vperm.xlu1 %1519, %v1691_v14   ;;  %v1925_v23 = vpop.permute.xlu1 %400  ;;  %v1927_v45 = vpop.permute.xlu0 %420 }
  0xf0   :  { %2625 = vst [vmem:[#allocation24_spill] sm:$0xff] %v1925_v23  ;;  %2626 = vst [vmem:[#allocation25_spill] sm:$0xff] %v1927_v45  ;;  %828 = vperm.xlu0 %1521, %v1667_v10  }
  0xf3   :  { %752 = vperm.xlu1 %1519, %v1703_v16   ;;  %v1936_v18 = vpop.permute.xlu1 %408  ;;  %v429_v39 = vpop.permute.xlu0 %428 }
  0xf4   :  { %v468_v37 = vmul.f32 %v1933_v52, %v429_v39  ;;  %836 = vperm.xlu0 %1521, %v1679_v12  }
  0xf6   :  { %v1940_v49 = vadd.f32 %v468_v37, %v384_v51 }
  0xf7   :  { %1522 = vset.pattern.permute.xlu1 %v1575_v42  ;;  %v1942_v3 = vpop.permute.xlu1 %416  ;;  %v437_v20 = vpop.permute.xlu0 %436 }
  0xf8   :  { %v470_v45 = vmul.f32 %v1933_v52, %v437_v20  ;;  %796 = vperm.xlu1 %1522, %v1636_v5   ;;  %844 = vperm.xlu0 %1521, %v1691_v14  }
  0xfa   :  { %v1947_v36 = vadd.f32 %v470_v45, %v386_v44  ;;  %v1576_v44 = vmov 8  }
  0xfb   :  { %v1949_v41 = vpop.permute.xlu1 %424  ;;  %v445_v62 = vpop.permute.xlu0 %444 }
  0xfc   :  { %v472_v39 = vmul.f32 %v1933_v52, %v445_v62  ;;  %800 = vperm.xlu1 %1522, %v1617_v1   ;;  %852 = vperm.xlu0 %1521, %v1703_v16  }
  0xfe   :  { %v1954_v51 = vadd.f32 %v472_v39, %v388_v35 }
  0xff   :  { %v433_v42 = vpop.permute.xlu1 %432  ;;  %v453_v37 = vpop.permute.xlu0 %452 }
 0x100   :  { %v469_v20 = vmul.f32 %v1933_v52, %v433_v42  ;;  %v474_v22 = vmul.f32 %v1933_v52, %v453_v37  ;;  %808 = vperm.xlu1 %1522, %v1648_v7   ;;  %1524 = vset.pattern.permute.xlu0 %v1576_v44 }
 0x101   :  { %896 = vperm.xlu0 %1524, %v1636_v5  }
 0x102   :  { %v485_v62 = vadd.f32 %v469_v20, %v1896_v43  ;;  %v1961_v45 = vadd.f32 %v474_v22, %v390_v38 }
 0x103   :  { %v441_v28 = vpop.permute.xlu1 %440 }
 0x104   :  { %v471_v35 = vmul.f32 %v1933_v52, %v441_v28  ;;  %816 = vperm.xlu1 %1522, %v1660_v9   ;;  %v1965_v39 = vpop.permute.xlu0 %496 }
 0x105   :  { %908 = vperm.xlu0 %1524, %v1648_v7  }
 0x106   :  { %v487_v42 = vadd.f32 %v471_v35, %v1902_v40 }
 0x107   :  { %v449_v37 = vpop.permute.xlu1 %448 }
 0x108   :  { %v473_v50 = vmul.f32 %v1933_v52, %v449_v37  ;;  %824 = vperm.xlu1 %1522, %v1672_v11   ;;  %v1971_v60 = vpop.permute.xlu0 %508 }
 0x109   :  { %916 = vperm.xlu0 %1524, %v1660_v9  }
 0x10a   :  { %v489_v22 = vadd.f32 %v473_v50, %v389_v48  ;;  %v1989_v48 = vld [vmem:[%s2600_s1 + $0x4] ss:$0 sm:$0xff] }
 0x10c   :  { %832 = vperm.xlu1 %1522, %v1684_v13   ;;  %v1975_v28 = vpop.permute.xlu1 %492  ;;  %v1977_v43 = vpop.permute.xlu0 %516 }
 0x10d   :  { %2627 = vst [vmem:[#allocation26_spill] sm:$0xff] %v1975_v28  ;;  %924 = vperm.xlu0 %1524, %v1672_v11  }
 0x110   :  { %840 = vperm.xlu1 %1522, %v1696_v15   ;;  %v1981_v40 = vpop.permute.xlu1 %500  ;;  %v1983_v38 = vpop.permute.xlu0 %524 }
 0x111   :  { %2628 = vst [vmem:[#allocation27_spill] sm:$0xff] %v1981_v40  ;;  %932 = vperm.xlu0 %1524, %v1684_v13  }
 0x114   :  { %848 = vperm.xlu1 %1522, %v1708_v17   ;;  %v1992_v50 = vpop.permute.xlu1 %504  ;;  %v533_v20 = vpop.permute.xlu0 %532 }
 0x115   :  { %2629 = vst [vmem:[#allocation28_spill] sm:$0xff] %v1992_v50  ;;  %v569_v35 = vmul.f32 %v1989_v48, %v533_v20  ;;  %940 = vperm.xlu0 %1524, %v1696_v15  }
 0x117   :  { %v1996_v37 = vadd.f32 %v569_v35, %v485_v62  ;;  %v1577_v62 = vmov 9  }
 0x118   :  { %1523 = vset.pattern.permute.xlu1 %v1576_v44  ;;  %v1998_v28 = vpop.permute.xlu1 %512  ;;  %v541_v40 = vpop.permute.xlu0 %540 }
 0x119   :  { %2630 = vst [vmem:[#allocation29_spill] sm:$0xff] %v1998_v28  ;;  %v571_v54 = vmul.f32 %v1989_v48, %v541_v40  ;;  %892 = vperm.xlu1 %1523, %v1622_v2   ;;  %948 = vperm.xlu0 %1524, %v1708_v17  }
 0x11b   :  { %v2003_v23 = vadd.f32 %v571_v54, %v487_v42 }
 0x11c   :  { %v2005_v50 = vpop.permute.xlu1 %520  ;;  %v549_v58 = vpop.permute.xlu0 %548 }
 0x11d   :  { %2631 = vst [vmem:[#allocation30_spill] sm:$0xff] %v2005_v50  ;;  %v573_v20 = vmul.f32 %v1989_v48, %v549_v58  ;;  %900 = vperm.xlu1 %1523, %v1617_v1   ;;  %1525 = vset.pattern.permute.xlu0 %v1577_v62 }
 0x11e   :  { %992 = vperm.xlu0 %1525, %v1622_v2  }
 0x11f   :  { %v2010_v44 = vadd.f32 %v573_v20, %v489_v22 }
 0x120   :  { %v529_v40 = vpop.permute.xlu1 %528 }
 0x121   :  { %v568_v35 = vmul.f32 %v1989_v48, %v529_v40  ;;  %904 = vperm.xlu1 %1523, %v1631_v4   ;;  %v2014_v54 = vpop.permute.xlu0 %592 }
 0x122   :  { %2632 = vst [vmem:[#allocation31_spill] sm:$0xff] %v2014_v54  ;;  %1004 = vperm.xlu0 %1525, %v1631_v4  }
 0x123   :  { %v584_v42 = vadd.f32 %v568_v35, %v1940_v49 }
 0x124   :  { %v537_v58 = vpop.permute.xlu1 %536 }
 0x125   :  { %v570_v50 = vmul.f32 %v1989_v48, %v537_v58  ;;  %912 = vperm.xlu1 %1523, %v1643_v6   ;;  %v2020_v28 = vpop.permute.xlu0 %604 }
 0x126   :  { %2633 = vst [vmem:[#allocation32_spill] sm:$0xff] %v2020_v28  ;;  %1012 = vperm.xlu0 %1525, %v1643_v6  }
 0x127   :  { %v586_v22 = vadd.f32 %v570_v50, %v1947_v36  ;;  %v2039_v50 = vld [vmem:[%s2600_s1 + $0x5] ss:$0 sm:$0xff] }
 0x128   :  { %v545_v20 = vpop.permute.xlu1 %544 }
 0x129   :  { %v572_v40 = vmul.f32 %v1989_v48, %v545_v20  ;;  %920 = vperm.xlu1 %1523, %v1655_v8   ;;  %v2026_v54 = vpop.permute.xlu0 %612 }
 0x12a   :  { %2634 = vst [vmem:[#allocation33_spill] sm:$0xff] %v2026_v54  ;;  %1020 = vperm.xlu0 %1525, %v1655_v8  }
 0x12b   :  { %v588_v49 = vadd.f32 %v572_v40, %v1954_v51 }
 0x12c   :  { %v553_v35 = vpop.permute.xlu1 %552 }
 0x12d   :  { %v574_v58 = vmul.f32 %v1989_v48, %v553_v35  ;;  %928 = vperm.xlu1 %1523, %v1667_v10   ;;  %v2032_v28 = vpop.permute.xlu0 %620 }
 0x12e   :  { %2635 = vst [vmem:[#allocation34_spill] sm:$0xff] %v2032_v28  ;;  %1028 = vperm.xlu0 %1525, %v1667_v10  }
 0x12f   :  { %v590_v36 = vadd.f32 %v574_v58, %v1961_v45 }
 0x131   :  { %936 = vperm.xlu1 %1523, %v1679_v12   ;;  %v2042_v20 = vpop.permute.xlu1 %596  ;;  %v629_v51 = vpop.permute.xlu0 %628 }
 0x132   :  { %v668_v40 = vmul.f32 %v2039_v50, %v629_v51  ;;  %1036 = vperm.xlu0 %1525, %v1679_v12  }
 0x134   :  { %v2046_v35 = vadd.f32 %v668_v40, %v584_v42 }
 0x135   :  { %944 = vperm.xlu1 %1523, %v1691_v14   ;;  %v2049_v28 = vpop.permute.xlu1 %600  ;;  %v637_v45 = vpop.permute.xlu0 %636 }
 0x136   :  { %2636 = vst [vmem:[#allocation35_spill] sm:$0xff] %v2049_v28  ;;  %v670_v58 = vmul.f32 %v2039_v50, %v637_v45  ;;  %1044 = vperm.xlu0 %1525, %v1691_v14  }
 0x138   :  { %v2053_v54 = vadd.f32 %v670_v58, %v586_v22  ;;  %v1578_v22 = vmov 10  }
 0x139   :  { %952 = vperm.xlu1 %1523, %v1703_v16   ;;  %v2056_v26 = vpop.permute.xlu1 %608  ;;  %v645_v51 = vpop.permute.xlu0 %644 }
 0x13a   :  { %v672_v46 = vmul.f32 %v2039_v50, %v645_v51  ;;  %1052 = vperm.xlu0 %1525, %v1703_v16  }
 0x13c   :  { %v2060_v42 = vadd.f32 %v672_v46, %v588_v49 }
 0x13d   :  { %1526 = vset.pattern.permute.xlu1 %v1577_v62  ;;  %v2062_v40 = vpop.permute.xlu1 %616  ;;  %v653_v28 = vpop.permute.xlu0 %652 }
 0x13e   :  { %v674_v45 = vmul.f32 %v2039_v50, %v653_v28  ;;  %996 = vperm.xlu1 %1526, %v1636_v5   ;;  %1528 = vset.pattern.permute.xlu0 %v1578_v22 }
 0x13f   :  { %1096 = vperm.xlu0 %1528, %v1636_v5  }
 0x140   :  { %v2067_v58 = vadd.f32 %v674_v45, %v590_v36 }
 0x141   :  { %v2069_v24 = vpop.permute.xlu1 %624 }
 0x142   :  { %1000 = vperm.xlu1 %1526, %v1617_v1   ;;  %v2072_v46 = vpop.permute.xlu0 %696 }
 0x143   :  { %1108 = vperm.xlu0 %1528, %v1648_v7  }
 0x145   :  { %v633_v62 = vpop.permute.xlu1 %632 }
 0x146   :  { %v669_v49 = vmul.f32 %v2039_v50, %v633_v62  ;;  %1008 = vperm.xlu1 %1526, %v1648_v7   ;;  %v2077_v28 = vpop.permute.xlu0 %708 }
 0x147   :  { %1116 = vperm.xlu0 %1528, %v1660_v9  }
 0x148   :  { %v685_v5 = vadd.f32 %v669_v49, %v1996_v37 }
 0x149   :  { %v641_v36 = vpop.permute.xlu1 %640 }
 0x14a   :  { %v671_v51 = vmul.f32 %v2039_v50, %v641_v36  ;;  %1016 = vperm.xlu1 %1526, %v1660_v9   ;;  %v2083_v45 = vpop.permute.xlu0 %716  ;;  %v2096_v9 = vld [vmem:[%s2600_s1 + $0x6] ss:$0 sm:$0xff] }
 0x14b   :  { %1124 = vperm.xlu0 %1528, %v1672_v11  }
 0x14c   :  { %v687_v57 = vadd.f32 %v671_v51, %v2003_v23 }
 0x14d   :  { %v649_v62 = vpop.permute.xlu1 %648 }
 0x14e   :  { %v673_v7 = vmul.f32 %v2039_v50, %v649_v62  ;;  %1024 = vperm.xlu1 %1526, %v1672_v11   ;;  %v2089_v21 = vpop.permute.xlu0 %724 }
 0x14f   :  { %1132 = vperm.xlu0 %1528, %v1684_v13  }
 0x150   :  { %v689_v37 = vadd.f32 %v673_v7, %v2010_v44 }
 0x152   :  { %1032 = vperm.xlu1 %1526, %v1684_v13   ;;  %v2099_v49 = vpop.permute.xlu1 %692  ;;  %v733_v23 = vpop.permute.xlu0 %732 }
 0x153   :  { %2637 = vst [vmem:[#allocation36_spill] sm:$0xff] %v2099_v49  ;;  %v769_v36 = vmul.f32 %v2096_v9, %v733_v23  ;;  %1140 = vperm.xlu0 %1528, %v1696_v15  }
 0x155   :  { %v2103_v11 = vadd.f32 %v769_v36, %v685_v5  ;;  %v2606_v5 = vmov 11  }
 0x156   :  { %1040 = vperm.xlu1 %1526, %v1696_v15   ;;  %v2106_v51 = vpop.permute.xlu1 %700  ;;  %v741_v44 = vpop.permute.xlu0 %740 }
 0x157   :  { %v771_v62 = vmul.f32 %v2096_v9, %v741_v44  ;;  %1148 = vperm.xlu0 %1528, %v1708_v17  }
 0x159   :  { %v2110_v7 = vadd.f32 %v771_v62, %v687_v57 }
 0x15a   :  { %1048 = vperm.xlu1 %1526, %v1708_v17   ;;  %v2113_v13 = vpop.permute.xlu1 %704  ;;  %v749_v23 = vpop.permute.xlu0 %748 }
 0x15b   :  { %v773_v49 = vmul.f32 %v2096_v9, %v749_v23  ;;  %1529 = vset.pattern.permute.xlu0 %v2606_v5 }
 0x15c   :  { %1192 = vperm.xlu0 %1529, %v1622_v2  }
 0x15d   :  { %v2118_v15 = vadd.f32 %v773_v49, %v689_v37 }
 0x15e   :  { %1527 = vset.pattern.permute.xlu1 %v1578_v22  ;;  %v2120_v36 = vpop.permute.xlu1 %712 }
 0x15f   :  { %1092 = vperm.xlu1 %1527, %v1622_v2   ;;  %v2123_v57 = vpop.permute.xlu0 %792 }
 0x160   :  { %2638 = vst [vmem:[#allocation37_spill] sm:$0xff] %v2123_v57  ;;  %1204 = vperm.xlu0 %1529, %v1631_v4   ;;  %v2149_v57 = vld [vmem:[%s2600_s1 + $0x7] ss:$0 sm:$0xff] }
 0x162   :  { %v2126_v17 = vpop.permute.xlu1 %720 }
 0x163   :  { %2639 = vst [vmem:[#allocation38_spill] sm:$0xff] %v2126_v17  ;;  %1100 = vperm.xlu1 %1527, %v1617_v1   ;;  %v2129_v44 = vpop.permute.xlu0 %804 }
 0x164   :  { %1212 = vperm.xlu0 %1529, %v1643_v6  }
 0x166   :  { %v729_v62 = vpop.permute.xlu1 %728 }
 0x167   :  { %v768_v37 = vmul.f32 %v2096_v9, %v729_v62  ;;  %1104 = vperm.xlu1 %1527, %v1631_v4   ;;  %v2134_v22 = vpop.permute.xlu0 %812  ;;  %v154_v62 = vmul.f32 %v1785_v30, %v1767_v25  ;;  %v260_v25 = vmul.f32 %v1843_v63, %v1816_v55 }
 0x168   :  { %1220 = vperm.xlu0 %1529, %v1655_v8  }
 0x169   :  { %v784_v2 = vadd.f32 %v768_v37, %v2046_v35 }
 0x16a   :  { %v737_v49 = vpop.permute.xlu1 %736 }
 0x16b   :  { %v770_v23 = vmul.f32 %v2096_v9, %v737_v49  ;;  %1112 = vperm.xlu1 %1527, %v1643_v6   ;;  %v2140_v1 = vpop.permute.xlu0 %820  ;;  %v176_v49 = vadd.f32 %v1795_v34, %v154_v62 }
 0x16c   :  { %2640 = vst [vmem:[#allocation39_spill] sm:$0xff] %v2140_v1  ;;  %1228 = vperm.xlu0 %1529, %v1667_v10  }
 0x16d   :  { %v786_v4 = vadd.f32 %v770_v23, %v2053_v54  ;;  %v276_v55 = vadd.f32 %v260_v25, %v176_v49  ;;  %v463_v25 = vmul.f32 %v1933_v52, %v1936_v18  ;;  %v563_v18 = vmul.f32 %v1989_v48, %v1971_v60 }
 0x16e   :  { %v745_v5 = vpop.permute.xlu1 %744 }
 0x16f   :  { %v772_v35 = vmul.f32 %v2096_v9, %v745_v5  ;;  %1120 = vperm.xlu1 %1527, %v1655_v8   ;;  %v829_v6 = vpop.permute.xlu0 %828  ;;  %v157_v5 = vmul.f32 %v1785_v30, %v1772_v27  ;;  %v360_v8 = vmul.f32 %v1889_v33, %v1865_v47  ;;  %v159_v47 = vmul.f32 %v1785_v30, %v1778_v29 }
 0x170   :  { %v868_v37 = vmul.f32 %v2149_v57, %v829_v6  ;;  %1236 = vperm.xlu0 %1529, %v1679_v12   ;;  %v265_v29 = vmul.f32 %v1843_v63, %v1834_v61 }
 0x171   :  { %v788_v54 = vadd.f32 %v772_v35, %v2060_v42  ;;  %v263_v42 = vmul.f32 %v1843_v63, %v1828_v59  ;;  %v376_v35 = vadd.f32 %v360_v8, %v276_v55  ;;  %v560_v59 = vmul.f32 %v1989_v48, %v1965_v39  ;;  %v24_v8 = vld [vmem:[%s2602_s3] sm:$0xff] }
 0x172   :  { %v2159_v23 = vadd.f32 %v868_v37, %v784_v2  ;;  %v753_v1 = vpop.permute.xlu1 %752  ;;  %v460_v2 = vmul.f32 %v1933_v52, %v1919_v56  ;;  %v363_v37 = vmul.f32 %v1889_v33, %v1871_v19  ;;  %v660_v19 = vmul.f32 %v2039_v50, %v2042_v20 }
 0x173   :  { %v774_v6 = vmul.f32 %v2096_v9, %v753_v1  ;;  %1128 = vperm.xlu1 %1527, %v1667_v10   ;;  %v837_v17 = vpop.permute.xlu0 %836  ;;  %v161_v10 = vmul.f32 %v1785_v30, %v1787_v32  ;;  %v181_v39 = vadd.f32 %v1795_v34, %v159_v47  ;;  %v760_v20 = vmul.f32 %v2096_v9, %v2072_v46 }
 0x174   :  { %v870_v62 = vmul.f32 %v2149_v57, %v837_v17  ;;  %1244 = vperm.xlu0 %1529, %v1691_v14   ;;  %v179_v17 = vadd.f32 %v1795_v34, %v157_v5  ;;  %v476_v49 = vadd.f32 %v460_v2, %v376_v35  ;;  %v365_v5 = vmul.f32 %v1889_v33, %v1877_v53 }
 0x175   :  { %v790_v27 = vadd.f32 %v774_v6, %v2067_v58  ;;  %v281_v53 = vadd.f32 %v265_v29, %v181_v39  ;;  %v465_v2 = vmul.f32 %v1933_v52, %v1942_v3  ;;  %v663_v46 = vmul.f32 %v2039_v50, %v2056_v26  ;;  %v25_v26 = vld [vmem:[%s2602_s3 + $0x8] sm:$0xff] }
 0x176   :  { %v2178_v1 = vadd.f32 %v870_v62, %v786_v4  ;;  %v279_v4 = vadd.f32 %v263_v42, %v179_v17  ;;  %v576_v62 = vadd.f32 %v560_v59, %v476_v49  ;;  %v2228_v59 = vld [vmem:[%s2600_s1 + $0x8] ss:$0 sm:$0xff]  ;;  %v763_v29 = vmul.f32 %v2096_v9, %v2077_v28 }
 0x177   :  { %1136 = vperm.xlu1 %1527, %v1679_v12   ;;  %v797_v56 = vpop.permute.xlu1 %796  ;;  %v845_v58 = vpop.permute.xlu0 %844  ;;  %v183_v12 = vadd.f32 %v1795_v34, %v161_v10  ;;  %v2641_v10 = vmov 0   ;;  %v381_v35 = vadd.f32 %v365_v5, %v281_v53  ;;  %v1532_v53 = vld [vmem:[%s2599_s0 + $0x8] sm:$0xff] }
 0x178   :  { %v872_v32 = vmul.f32 %v2149_v57, %v845_v58  ;;  %1252 = vperm.xlu0 %1529, %v1703_v16   ;;  %v379_v6 = vadd.f32 %v363_v37, %v279_v4  ;;  %v676_v17 = vadd.f32 %v660_v19, %v576_v62  ;;  %v367_v37 = vmul.f32 %v1889_v33, %v1882_v31 }
 0x179   :  { %v665_v4 = vmul.f32 %v2039_v50, %v2062_v40  ;;  %v765_v40 = vmul.f32 %v2096_v9, %v2083_v45  ;;  %v2642_v62 = vmov 11  }
 0x17a   :  { %v2198_v61 = vadd.f32 %v872_v32, %v788_v54  ;;  %v267_v54 = vmul.f32 %v1843_v63, %v1845_v0  ;;  %v479_v60 = vadd.f32 %v463_v25, %v379_v6  ;;  %v565_v0 = vmul.f32 %v1989_v48, %v1977_v43 }
 0x17b   :  { %1144 = vperm.xlu1 %1527, %v1691_v14   ;;  %v2208_v55 = vpop.permute.xlu1 %800  ;;  %v853_v42 = vpop.permute.xlu0 %852  ;;  %v860_v14 = vmul.f32 %v2149_v57, %v797_v56  ;;  %v776_v58 = vadd.f32 %v760_v20, %v676_v17  ;;  %v467_v32 = vmul.f32 %v1933_v52, %v1949_v41  ;;  %v567_v41 = vmul.f32 %v1989_v48, %v1983_v38 }
 0x17c   :  { %v874_v47 = vmul.f32 %v2149_v57, %v853_v42  ;;  %1531 = vset.pattern.permute.xlu0 %v2641_v10  ;;  %v579_v56 = vadd.f32 %v563_v18, %v479_v60  ;;  %v283_v43 = vadd.f32 %v267_v54, %v183_v12  ;;  %v667_v38 = vmul.f32 %v2039_v50, %v2069_v24  ;;  %v27_v10 = vld [vmem:[%s2602_s3 + $0x18] sm:$0xff]  ;;  %v1533_v24 = vld [vmem:[%s2599_s0 + $0x10] sm:$0xff] }
 0x17d   :  { %1341 = vperm.xlu0 %1531, %v24_v8   ;;  %v876_v19 = vadd.f32 %v860_v14, %v776_v58 }
 0x17e   :  { %v2223_v3 = vadd.f32 %v874_v47, %v790_v27  ;;  %v481_v27 = vadd.f32 %v465_v2, %v381_v35  ;;  %v679_v25 = vadd.f32 %v663_v46, %v579_v56  ;;  %v383_v28 = vadd.f32 %v367_v37, %v283_v43 }
 0x17f   :  { %1152 = vperm.xlu1 %1527, %v1703_v16   ;;  %v809_v31 = vpop.permute.xlu1 %808  ;;  %v26_v16 = vld [vmem:[%s2602_s3 + $0x10] sm:$0xff]  ;;  %v767_v46 = vmul.f32 %v2096_v9, %v2089_v21  ;;  %v28_v21 = vld [vmem:[%s2602_s3 + $0x20] sm:$0xff] }
 0x180   :  { %v897_v49 = vpop.permute.xlu0 %896  ;;  %v863_v39 = vmul.f32 %v2149_v57, %v809_v31  ;;  %v581_v8 = vadd.f32 %v565_v0, %v481_v27  ;;  %v779_v12 = vadd.f32 %v763_v29, %v679_v25  ;;  %v483_v20 = vadd.f32 %v467_v32, %v383_v28  ;;  %v2643_v29 = vld [vmem:[#allocation6_spill] sm:$0xff] }
 0x181   :  { %v960_v5 = vmul.f32 %v2228_v59, %v897_v49  ;;  %1346 = vperm.xlu0 %1531, %v25_v26   ;;  %v155_v31 = vmul.f32 %v1785_v30, %v2643_v29  ;;  %v1534_v49 = vld [vmem:[%s2599_s0 + $0x20] sm:$0xff]  ;;  %v2652_v29 = vld [vmem:[#allocation27_spill] sm:$0xff] }
 0x182   :  { %v681_v42 = vadd.f32 %v665_v4, %v581_v8  ;;  %v879_v2 = vadd.f32 %v863_v39, %v779_v12  ;;  %v583_v60 = vadd.f32 %v567_v41, %v483_v20  ;;  %v2645_v8 = vld [vmem:[#allocation8_spill] sm:$0xff]  ;;  %v29_v12 = vld [vmem:[%s2602_s3 + $0x28] sm:$0xff] }
 0x183   :  { %v2249_v6 = vadd.f32 %v960_v5, %v876_v19  ;;  %1530 = vset.pattern.permute.xlu1 %v2642_v62  ;;  %v817_v18 = vpop.permute.xlu1 %816  ;;  %v2644_v19 = vld [vmem:[#allocation12_spill] sm:$0xff]  ;;  %v2646_v62 = vld [vmem:[#allocation17_spill] sm:$0xff] }
 0x184   :  { %1196 = vperm.xlu1 %1530, %v1532_v53   ;;  %v909_v54 = vpop.permute.xlu0 %908  ;;  %v865_v47 = vmul.f32 %v2149_v57, %v817_v18  ;;  %v781_v17 = vadd.f32 %v765_v40, %v681_v42  ;;  %v683_v0 = vadd.f32 %v667_v38, %v583_v60  ;;  %v261_v39 = vmul.f32 %v1843_v63, %v2644_v19  ;;  %v2647_v53 = vld [vmem:[#allocation9_spill] sm:$0xff]  ;;  %v2649_v60 = vld [vmem:[#allocation24_spill] sm:$0xff] }
 0x185   :  { %v963_v45 = vmul.f32 %v2228_v59, %v909_v54  ;;  %1351 = vperm.xlu0 %1531, %v26_v16   ;;  %v156_v16 = vmul.f32 %v1785_v30, %v2645_v8  ;;  %v177_v40 = vadd.f32 %v1795_v34, %v155_v31  ;;  %v361_v18 = vmul.f32 %v1889_v33, %v2646_v62  ;;  %v2648_v38 = vld [vmem:[#allocation13_spill] sm:$0xff] }
 0x186   :  { %v881_v26 = vadd.f32 %v865_v47, %v781_v17  ;;  %v783_v43 = vadd.f32 %v767_v46, %v683_v0  ;;  %v158_v54 = vmul.f32 %v1785_v30, %v2647_v53  ;;  %v1535_v47 = vld [vmem:[%s2599_s0 + $0x30] sm:$0xff]  ;;  %v461_v17 = vmul.f32 %v1933_v52, %v2649_v60 }
 0x187   :  { %v2264_v14 = vadd.f32 %v963_v45, %v879_v2  ;;  %v825_v35 = vpop.permute.xlu1 %824  ;;  %v262_v2 = vmul.f32 %v1843_v63, %v2648_v38  ;;  %v561_v31 = vmul.f32 %v1989_v48, %v2652_v29  ;;  %v2657_v53 = vld [vmem:[#allocation28_spill] sm:$0xff] }
 0x188   :  { %1200 = vperm.xlu1 %1530, %v1533_v24   ;;  %v917_v37 = vpop.permute.xlu0 %916  ;;  %v867_v56 = vmul.f32 %v2149_v57, %v825_v35  ;;  %v178_v35 = vadd.f32 %v1795_v34, %v156_v16  ;;  %v2650_v24 = vld [vmem:[#allocation18_spill] sm:$0xff]  ;;  %v2661_v29 = vld [vmem:[#allocation20_spill] sm:$0xff] }
 0x189   :  { %v965_v58 = vmul.f32 %v2228_v59, %v917_v37  ;;  %1356 = vperm.xlu0 %1531, %v27_v10   ;;  %v277_v10 = vadd.f32 %v261_v39, %v177_v40  ;;  %v362_v37 = vmul.f32 %v1889_v33, %v2650_v24  ;;  %v1536_v39 = vld [vmem:[%s2599_s0 + $0x40] sm:$0xff]  ;;  %v2660_v24 = vld [vmem:[#allocation32_spill] sm:$0xff] }
 0x18a   :  { %v883_v5 = vadd.f32 %v867_v56, %v783_v43  ;;  %v2651_v56 = vld [vmem:[#allocation14_spill] sm:$0xff] }
 0x18b   :  { %v2276_v27 = vadd.f32 %v965_v58, %v881_v26  ;;  %v833_v32 = vpop.permute.xlu1 %832  ;;  %v30_v26 = vld [vmem:[%s2602_s3 + $0x30] sm:$0xff]  ;;  %v264_v58 = vmul.f32 %v1843_v63, %v2651_v56  ;;  %v861_v56 = vmul.f32 %v2149_v57, %v2208_v55  ;;  %v762_v55 = vmul.f32 %v2096_v9, %v2113_v13 }
 0x18c   :  { %v869_v4 = vmul.f32 %v2149_v57, %v833_v32  ;;  %1208 = vperm.xlu1 %1530, %v1534_v49   ;;  %v925_v25 = vpop.permute.xlu0 %924  ;;  %v278_v49 = vadd.f32 %v262_v2, %v178_v35  ;;  %v862_v13 = vmul.f32 %v2149_v57, %v2129_v44 }
 0x18d   :  { %v967_v28 = vmul.f32 %v2228_v59, %v925_v25  ;;  %1361 = vperm.xlu0 %1531, %v28_v21   ;;  %v377_v21 = vadd.f32 %v361_v18, %v277_v10  ;;  %v2653_v25 = vld [vmem:[#allocation22_spill] sm:$0xff]  ;;  %v2656_v18 = vld [vmem:[#allocation19_spill] sm:$0xff] }
 0x18e   :  { %v885_v41 = vadd.f32 %v869_v4, %v2103_v11  ;;  %v180_v4 = vadd.f32 %v1795_v34, %v158_v54  ;;  %v378_v62 = vadd.f32 %v362_v37, %v278_v49  ;;  %v562_v54 = vmul.f32 %v1989_v48, %v2657_v53  ;;  %v2658_v10 = vld [vmem:[#allocation15_spill] sm:$0xff]  ;;  %v2662_v49 = vld [vmem:[#allocation29_spill] sm:$0xff]  ;;  %v2665_v53 = vld [vmem:[#allocation30_spill] sm:$0xff] }
 0x18f   :  { %v2294_v20 = vadd.f32 %v967_v28, %v883_v5  ;;  %v841_v42 = vpop.permute.xlu1 %840  ;;  %v2654_v28 = vld [vmem:[#allocation10_spill] sm:$0xff]  ;;  %v477_v16 = vadd.f32 %v461_v17, %v377_v21  ;;  %v266_v60 = vmul.f32 %v1843_v63, %v2658_v10  ;;  %v1537_v37 = vld [vmem:[%s2599_s0 + $0x50] sm:$0xff] }
 0x190   :  { %v871_v11 = vmul.f32 %v2149_v57, %v841_v42  ;;  %1216 = vperm.xlu1 %1530, %v1535_v47   ;;  %v933_v45 = vpop.permute.xlu0 %932  ;;  %v160_v8 = vmul.f32 %v1785_v30, %v2654_v28  ;;  %v364_v42 = vmul.f32 %v1889_v33, %v2656_v18  ;;  %v31_v30 = vld [vmem:[%s2602_s3 + $0x38] sm:$0xff]  ;;  %v280_v2 = vadd.f32 %v264_v58, %v180_v4  ;;  %v32_v4 = vld [vmem:[%s2602_s3 + $0x40] sm:$0xff] }
 0x191   :  { %v969_v46 = vmul.f32 %v2228_v59, %v933_v45  ;;  %1366 = vperm.xlu0 %1531, %v29_v12   ;;  %v761_v47 = vmul.f32 %v2096_v9, %v2106_v51  ;;  %v2666_v10 = vld [vmem:[#allocation34_spill] sm:$0xff] }
 0x192   :  { %v887_v0 = vadd.f32 %v871_v11, %v2110_v7  ;;  %v462_v7 = vmul.f32 %v1933_v52, %v2653_v25  ;;  %v577_v11 = vadd.f32 %v561_v31, %v477_v16  ;;  %v182_v58 = vadd.f32 %v1795_v34, %v160_v8  ;;  %v1538_v8 = vld [vmem:[%s2599_s0 + $0x60] sm:$0xff] }
 0x193   :  { %v2318_v43 = vadd.f32 %v969_v46, %v885_v41  ;;  %v849_v32 = vpop.permute.xlu1 %848  ;;  %v2655_v41 = vld [vmem:[#allocation35_spill] sm:$0xff]  ;;  %v380_v21 = vadd.f32 %v364_v42, %v280_v2  ;;  %v366_v31 = vmul.f32 %v1889_v33, %v2661_v29  ;;  %v564_v25 = vmul.f32 %v1989_v48, %v2662_v49 }
 0x194   :  { %v873_v19 = vmul.f32 %v2149_v57, %v849_v32  ;;  %1224 = vperm.xlu1 %1530, %v1536_v39   ;;  %v941_v5 = vpop.permute.xlu0 %940  ;;  %v661_v12 = vmul.f32 %v2039_v50, %v2655_v41  ;;  %v478_v17 = vadd.f32 %v462_v7, %v378_v62  ;;  %v2659_v46 = vld [vmem:[#allocation23_spill] sm:$0xff]  ;;  %v282_v39 = vadd.f32 %v266_v60, %v182_v58  ;;  %v2664_v41 = vld [vmem:[#allocation33_spill] sm:$0xff] }
 0x195   :  { %v971_v40 = vmul.f32 %v2228_v59, %v941_v5  ;;  %1371 = vperm.xlu0 %1531, %v30_v26   ;;  %v464_v35 = vmul.f32 %v1933_v52, %v2659_v46  ;;  %v2663_v5 = vld [vmem:[#allocation25_spill] sm:$0xff]  ;;  %v666_v60 = vmul.f32 %v2039_v50, %v2666_v10  ;;  %v2668_v49 = vld [vmem:[#allocation39_spill] sm:$0xff] }
 0x196   :  { %v889_v38 = vadd.f32 %v873_v19, %v2118_v15  ;;  %v662_v15 = vmul.f32 %v2039_v50, %v2660_v24  ;;  %v578_v32 = vadd.f32 %v562_v54, %v478_v17  ;;  %v466_v28 = vmul.f32 %v1933_v52, %v2663_v5  ;;  %v1539_v17 = vld [vmem:[%s2599_s0 + $0x70] sm:$0xff]  ;;  %v35_v5 = vld [vmem:[%s2602_s3 + $0x58] sm:$0xff] }
 0x197   :  { %v2342_v45 = vadd.f32 %v971_v40, %v887_v0  ;;  %v677_v0 = vadd.f32 %v661_v12, %v577_v11  ;;  %v480_v34 = vadd.f32 %v464_v35, %v380_v21  ;;  %v664_v12 = vmul.f32 %v2039_v50, %v2664_v41  ;;  %v2667_v21 = vld [vmem:[#allocation38_spill] sm:$0xff] }
 0x198   :  { %1232 = vperm.xlu1 %1530, %v1537_v37   ;;  %v2353_v26 = vpop.permute.xlu1 %892  ;;  %v949_v51 = vpop.permute.xlu0 %948  ;;  %v678_v33 = vadd.f32 %v662_v15, %v578_v32  ;;  %v382_v42 = vadd.f32 %v366_v31, %v282_v39  ;;  %v566_v54 = vmul.f32 %v1989_v48, %v2665_v53  ;;  %v764_v11 = vmul.f32 %v2096_v9, %v2120_v36  ;;  %v2401_v36 = vld [vmem:[%s2600_s1 + $0x9] ss:$0 sm:$0xff] }
 0x199   :  { %v973_v63 = vmul.f32 %v2228_v59, %v949_v51  ;;  %1376 = vperm.xlu0 %1531, %v31_v30   ;;  %v777_v7 = vadd.f32 %v761_v47, %v677_v0  ;;  %v580_v30 = vadd.f32 %v564_v25, %v480_v34  ;;  %v864_v15 = vmul.f32 %v2149_v57, %v2134_v22 }
 0x19a   :  { %v778_v2 = vadd.f32 %v762_v55, %v678_v33  ;;  %v482_v47 = vadd.f32 %v466_v28, %v382_v42  ;;  %v766_v22 = vmul.f32 %v2096_v9, %v2667_v21  ;;  %v866_v25 = vmul.f32 %v2149_v57, %v2668_v49 }
 0x19b   :  { %v2368_v19 = vadd.f32 %v973_v63, %v889_v38  ;;  %v877_v40 = vadd.f32 %v861_v56, %v777_v7  ;;  %v33_v38 = vld [vmem:[%s2602_s3 + $0x48] sm:$0xff]  ;;  %v680_v35 = vadd.f32 %v664_v12, %v580_v30  ;;  %v34_v63 = vld [vmem:[%s2602_s3 + $0x50] sm:$0xff] }
 0x19c   :  { %1240 = vperm.xlu1 %1530, %v1538_v8   ;;  %v901_v16 = vpop.permute.xlu1 %900  ;;  %v878_v24 = vadd.f32 %v862_v13, %v778_v2  ;;  %v582_v0 = vadd.f32 %v566_v54, %v482_v47 }
 0x19d   :  { %v961_v62 = vmul.f32 %v2228_v59, %v901_v16  ;;  %v2380_v18 = vpop.permute.xlu0 %992  ;;  %1381 = vperm.xlu0 %1531, %v32_v4   ;;  %v780_v58 = vadd.f32 %v764_v11, %v680_v35  ;;  %v37_v11 = vld [vmem:[%s2602_s3 + $0x68] sm:$0xff] }
 0x19e   :  { %v682_v31 = vadd.f32 %v666_v60, %v582_v0 }
 0x19f   :  { %v2389_v44 = vadd.f32 %v961_v62, %v877_v40  ;;  %v880_v4 = vadd.f32 %v864_v15, %v780_v58  ;;  %v36_v62 = vld [vmem:[%s2602_s3 + $0x60] sm:$0xff] }
 0x1a0   :  { %1248 = vperm.xlu1 %1530, %v1539_v17   ;;  %v905_v46 = vpop.permute.xlu1 %904  ;;  %v782_v28 = vadd.f32 %v766_v22, %v682_v31 }
 0x1a1   :  { %v962_v37 = vmul.f32 %v2228_v59, %v905_v46  ;;  %v1005_v51 = vpop.permute.xlu0 %1004  ;;  %1386 = vperm.xlu0 %1531, %v33_v38  }
 0x1a2   :  { %v1062_v56 = vmul.f32 %v2401_v36, %v1005_v51  ;;  %v882_v16 = vadd.f32 %v866_v25, %v782_v28 }
 0x1a3   :  { %v978_v29 = vadd.f32 %v962_v37, %v878_v24  ;;  %v38_v24 = vld [vmem:[%s2602_s3 + $0x70] sm:$0xff] }
 0x1a4   :  { %v913_v32 = vpop.permute.xlu1 %912 }
 0x1a5   :  { %v2412_v7 = vadd.f32 %v1062_v56, %v978_v29  ;;  %v964_v55 = vmul.f32 %v2228_v59, %v913_v32  ;;  %v1013_v39 = vpop.permute.xlu0 %1012  ;;  %1391 = vperm.xlu0 %1531, %v34_v63   ;;  %v39_v63 = vld [vmem:[%s2602_s3 + $0x78] sm:$0xff]  ;;  %v40_v32 = vld [vmem:[#allocation2] sm:$0x1] }
 0x1a6   :  { %v1064_v34 = vmul.f32 %v2401_v36, %v1013_v39 }
 0x1a7   :  { %v980_v33 = vadd.f32 %v964_v55, %v880_v4 }
 0x1a8   :  { %v921_v8 = vpop.permute.xlu1 %920 }
 0x1a9   :  { %v2419_v41 = vadd.f32 %v1064_v34, %v980_v33  ;;  %v966_v12 = vmul.f32 %v2228_v59, %v921_v8  ;;  %v1021_v13 = vpop.permute.xlu0 %1020  ;;  %1396 = vperm.xlu0 %1531, %v35_v5  }
 0x1aa   :  { %v1066_v40 = vmul.f32 %v2401_v36, %v1021_v13 }
 0x1ab   :  { %v982_v42 = vadd.f32 %v966_v12, %v882_v16 }
 0x1ac   :  { %v929_v53 = vpop.permute.xlu1 %928 }
 0x1ad   :  { %v2426_v54 = vadd.f32 %v1066_v40, %v982_v42  ;;  %v968_v38 = vmul.f32 %v2228_v59, %v929_v53  ;;  %v1029_v30 = vpop.permute.xlu0 %1028  ;;  %1401 = vperm.xlu0 %1531, %v36_v62   ;;  %v2669_v40 = vld [vmem:[#allocation7_spill] sm:$0xff] }
 0x1ae   :  { %v1068_v2 = vmul.f32 %v2401_v36, %v1029_v30 }
 0x1af   :  { %v984_v47 = vadd.f32 %v968_v38, %v2159_v23 }
 0x1b0   :  { %v937_v10 = vpop.permute.xlu1 %936 }
 0x1b1   :  { %v2434_v60 = vadd.f32 %v1068_v2, %v984_v47  ;;  %v970_v17 = vmul.f32 %v2228_v59, %v937_v10  ;;  %v1037_v46 = vpop.permute.xlu0 %1036  ;;  %1406 = vperm.xlu0 %1531, %v37_v11   ;;  %v1541_v11 = vld [vmem:[%s2601_s2] ss:$0 sm:$0xff]  ;;  %v1542_v10 = vld [vmem:[%s2600_s1 + $0x1] ss:$0 sm:$0xff] }
 0x1b2   :  { %v1070_v35 = vmul.f32 %v2401_v36, %v1037_v46 }
 0x1b3   :  { %v986_v15 = vadd.f32 %v970_v17, %v2178_v1  ;;  %v2670_v17 = vld [vmem:[#allocation11_spill] sm:$0xff] }
 0x1b4   :  { %v945_v37 = vpop.permute.xlu1 %944  ;;  %v259_v46 = vmul.f32 %v1542_v10, %v2670_v17 }
 0x1b5   :  { %v2442_v51 = vadd.f32 %v1070_v35, %v986_v15  ;;  %v972_v23 = vmul.f32 %v2228_v59, %v945_v37  ;;  %v1045_v0 = vpop.permute.xlu0 %1044  ;;  %1411 = vperm.xlu0 %1531, %v38_v24   ;;  %v1543_v35 = vld [vmem:[%s2600_s1 + $0x2] ss:$0 sm:$0xff]  ;;  %v2671_v24 = vld [vmem:[#allocation16_spill] sm:$0xff] }
 0x1b6   :  { %v1072_v56 = vmul.f32 %v2401_v36, %v1045_v0  ;;  %v359_v15 = vmul.f32 %v1543_v35, %v2671_v24 }
 0x1b7   :  { %v988_v58 = vadd.f32 %v972_v23, %v2198_v61 }
 0x1b8   :  { %v953_v21 = vpop.permute.xlu1 %952 }
 0x1b9   :  { %v2450_v22 = vadd.f32 %v1072_v56, %v988_v58  ;;  %v974_v1 = vmul.f32 %v2228_v59, %v953_v21  ;;  %v1053_v29 = vpop.permute.xlu0 %1052  ;;  %1416 = vperm.xlu0 %1531, %v39_v63   ;;  %v2672_v21 = vld [vmem:[#allocation21_spill] sm:$0xff] }
 0x1ba   :  { %v1074_v31 = vmul.f32 %v2401_v36, %v1053_v29 }
 0x1bb   :  { %v990_v4 = vadd.f32 %v974_v1, %v2223_v3  ;;  %v2470_v3 = vld [vmem:[%s2600_s1 + $0xa] ss:$0 sm:$0xff]  ;;  %v459_v1 = vmul.f32 %v1933_v52, %v2672_v21 }
 0x1bd   :  { %v2455_v49 = vadd.f32 %v1074_v31, %v990_v4  ;;  %v997_v25 = vpop.permute.xlu1 %996  ;;  %1458 = vperm.xlu0 %1531, %v40_v32   ;;  %v2673_v32 = vld [vmem:[#allocation26_spill] sm:$0xff] }
 0x1be   :  { %v1060_v55 = vmul.f32 %v2401_v36, %v997_v25  ;;  %v2458_v39 = vpop.permute.xlu0 %1096  ;;  %v559_v4 = vmul.f32 %v1989_v48, %v2673_v32 }
 0x1c0   :  { %v2461_v61 = vadd.f32 %v1060_v55, %v2249_v6  ;;  %v1540_v6 = vld [vmem:[%s2600_s1] ss:$0 sm:$0xff] }
 0x1c1   :  { %v1001_v34 = vpop.permute.xlu1 %1000  ;;  %v153_v62 = vmul.f32 %v1540_v6, %v2669_v40 }
 0x1c2   :  { %v1061_v5 = vmul.f32 %v2401_v36, %v1001_v34  ;;  %v1109_v28 = vpop.permute.xlu0 %1108 }
 0x1c3   :  { %v1163_v12 = vmul.f32 %v2470_v3, %v1109_v28  ;;  %v175_v47 = vadd.f32 %v1541_v11, %v153_v62 }
 0x1c4   :  { %v2465_v33 = vadd.f32 %v1061_v5, %v2389_v44 }
 0x1c5   :  { %v1009_v8 = vpop.permute.xlu1 %1008  ;;  %v275_v58 = vadd.f32 %v259_v46, %v175_v47  ;;  %v1059_v46 = vmul.f32 %v2401_v36, %v2380_v18 }
 0x1c6   :  { %v1063_v16 = vmul.f32 %v2401_v36, %v1009_v8  ;;  %v1117_v13 = vpop.permute.xlu0 %1116  ;;  %v2674_v8 = vld [vmem:[#allocation31_spill] sm:$0xff] }
 0x1c7   :  { %v1165_v30 = vmul.f32 %v2470_v3, %v1117_v13  ;;  %v375_v31 = vadd.f32 %v359_v15, %v275_v58 }
 0x1c8   :  { %v1079_v44 = vadd.f32 %v1063_v16, %v2264_v14  ;;  %v659_v16 = vmul.f32 %v2039_v50, %v2674_v8  ;;  %v1160_v8 = vmul.f32 %v2470_v3, %v2458_v39 }
 0x1c9   :  { %v1017_v42 = vpop.permute.xlu1 %1016  ;;  %v475_v28 = vadd.f32 %v459_v1, %v375_v31 }
 0x1ca   :  { %v2479_v53 = vadd.f32 %v1163_v12, %v1079_v44  ;;  %v1065_v38 = vmul.f32 %v2401_v36, %v1017_v42  ;;  %v1125_v2 = vpop.permute.xlu0 %1124 }
 0x1cb   :  { %v1167_v56 = vmul.f32 %v2470_v3, %v1125_v2  ;;  %v575_v13 = vadd.f32 %v559_v4, %v475_v28 }
 0x1cc   :  { %v1081_v14 = vadd.f32 %v1065_v38, %v2276_v27  ;;  %v2676_v38 = vld [vmem:[#allocation37_spill] sm:$0xff] }
 0x1cd   :  { %v1025_v37 = vpop.permute.xlu1 %1024  ;;  %v675_v42 = vadd.f32 %v659_v16, %v575_v13 }
 0x1ce   :  { %v2495_v23 = vadd.f32 %v1165_v30, %v1081_v14  ;;  %v1067_v0 = vmul.f32 %v2401_v36, %v1025_v37  ;;  %v1133_v63 = vpop.permute.xlu0 %1132  ;;  %v859_v30 = vmul.f32 %v2149_v57, %v2676_v38 }
 0x1cf   :  { %v1169_v27 = vmul.f32 %v2470_v3, %v1133_v63 }
 0x1d0   :  { %v1083_v29 = vadd.f32 %v1067_v0, %v2294_v20  ;;  %v2675_v20 = vld [vmem:[#allocation36_spill] sm:$0xff] }
 0x1d1   :  { %v1033_v25 = vpop.permute.xlu1 %1032  ;;  %v759_v6 = vmul.f32 %v2096_v9, %v2675_v20 }
 0x1d2   :  { %v2505_v55 = vadd.f32 %v1167_v56, %v1083_v29  ;;  %v1069_v34 = vmul.f32 %v2401_v36, %v1033_v25  ;;  %v1141_v5 = vpop.permute.xlu0 %1140 }
 0x1d3   :  { %v1171_v52 = vmul.f32 %v2470_v3, %v1141_v5  ;;  %v775_v11 = vadd.f32 %v759_v6, %v675_v42 }
 0x1d4   :  { %v1085_v12 = vadd.f32 %v1069_v34, %v2318_v43  ;;  %v959_v43 = vmul.f32 %v2228_v59, %v2353_v26 }
 0x1d5   :  { %v1041_v40 = vpop.permute.xlu1 %1040  ;;  %v875_v17 = vadd.f32 %v859_v30, %v775_v11 }
 0x1d6   :  { %v2514_v48 = vadd.f32 %v1169_v27, %v1085_v12  ;;  %v1071_v62 = vmul.f32 %v2401_v36, %v1041_v40  ;;  %v1149_v44 = vpop.permute.xlu0 %1148 }
 0x1d7   :  { %v1173_v50 = vmul.f32 %v2470_v3, %v1149_v44  ;;  %v975_v35 = vadd.f32 %v959_v43, %v875_v17 }
 0x1d8   :  { %v1087_v2 = vadd.f32 %v1071_v62, %v2342_v45  ;;  %v2532_v45 = vld [vmem:[%s2600_s1 + $0xb] ss:$0 sm:$0xff]  ;;  %s1580_s1 = smov [#allocation3]  }
 0x1d9   :  { %v1049_v47 = vpop.permute.xlu1 %1048  ;;  %v1075_v26 = vadd.f32 %v1059_v46, %v975_v35  ;;  %s1473_s26 = sshll.u32 %s1580_s1, 4  ;;  %s1474_s26 = int_to_ptr.vmem [resolvable:$true] %s1473_s26 }
 0x1da   :  { %v2523_v9 = vadd.f32 %v1171_v52, %v1087_v2  ;;  %v1073_v10 = vmul.f32 %v2401_v36, %v1049_v47  ;;  %v1176_v52 = vadd.f32 %v1160_v8, %v2461_v61  ;;  %s1544_s27 = scalar_lea.vmem %s1474_s26, 16  ;;  %s1548_s28 = scalar_lea.vmem %s1474_s26, 32 }
 0x1db   :  { %v1193_v57 = vpop.permute.xlu0 %1192  ;;  %p1545_p0 = scmp.ne.s32.totalorder %s1474_s26, %s1544_s27  ;;  %p1549_p1 = scmp.lt.s32.totalorder %s1474_s26, %s1474_s26 }
 0x1dc   :  { %v1089_v14 = vadd.f32 %v1073_v10, %v2368_v19  ;;  %v1259_v37 = vmul.f32 %v2532_v45, %v1193_v57  ;;  %p1550_p2 = scmp.lt.s32.totalorder %s1548_s28, %s1544_s27 }
 0x1de   :  { %v2534_v24 = vadd.f32 %v1173_v50, %v1089_v14  ;;  %v1093_v59 = vpop.permute.xlu1 %1092  ;;  %p1551_p3 = por %p1550_p2, %p1549_p1 }
 0x1df   :  { %v1159_v15 = vmul.f32 %v2470_v3, %v1093_v59  ;;  %v1205_v13 = vpop.permute.xlu0 %1204 }
 0x1e0   :  { %v1262_v6 = vmul.f32 %v2532_v45, %v1205_v13  ;;  %p1552_p4 = pnand %p1551_p3, %p1545_p0 }
 0x1e1   :  { %v1175_v0 = vadd.f32 %v1159_v15, %v1075_v26 }
 0x1e2   :  { %v1101_v56 = vpop.permute.xlu1 %1100 }
 0x1e3   :  { %v1275_v18 = vadd.f32 %v1259_v37, %v1175_v0  ;;  %v1213_v11 = vpop.permute.xlu0 %1212 }
 0x1e5   :  { %v1291_v36 = vmax.f32 %v1275_v18, 0.0 }
 0x1e6   :  { %v1105_v19 = vpop.permute.xlu1 %1104 }
 0x1e7   :  { %1307 = vxpose.xlu1.b32.start [1/16] %v1291_v36, 128  ;;  %v1162_v12 = vmul.f32 %v2470_v3, %v1105_v19  ;;  %v1221_v35 = vpop.permute.xlu0 %1220 }
 0x1e8   :  { %v1266_v15 = vmul.f32 %v2532_v45, %v1221_v35 }
 0x1e9   :  { %v1178_v39 = vadd.f32 %v1162_v12, %v2412_v7 }
 0x1ea   :  { %v1113_v63 = vpop.permute.xlu1 %1112 }
 0x1eb   :  { %v1278_v38 = vadd.f32 %v1262_v6, %v1178_v39  ;;  %v1164_v30 = vmul.f32 %v2470_v3, %v1113_v63  ;;  %v1229_v18 = vpop.permute.xlu0 %1228 }
 0x1ec   :  { %v1268_v36 = vmul.f32 %v2532_v45, %v1229_v18 }
 0x1ed   :  { %v1294_v43 = vmax.f32 %v1278_v38, 0.0  ;;  %v1180_v47 = vadd.f32 %v1164_v30, %v2419_v41 }
 0x1ee   :  { %v1121_v58 = vpop.permute.xlu1 %1120 }
 0x1ef   :  { %v1166_v46 = vmul.f32 %v2470_v3, %v1121_v58 }
 0x1f1   :  { %v1182_v26 = vadd.f32 %v1166_v46, %v2426_v54 }
 0x1f2   :  { %v1129_v21 = vpop.permute.xlu1 %1128 }
 0x1f3   :  { %v1168_v1 = vmul.f32 %v2470_v3, %v1129_v21 }
 0x1f5   :  { %v1184_v27 = vadd.f32 %v1168_v1, %v2434_v60 }
 0x1f6   :  { %v1137_v29 = vpop.permute.xlu1 %1136 }
 0x1f7   :  { %v1170_v31 = vmul.f32 %v2470_v3, %v1137_v29  ;;  %v1284_v54 = vadd.f32 %v1268_v36, %v1184_v27 }
 0x1f9   :  { %v2542_v32 = vadd.f32 %v1170_v31, %v2442_v51  ;;  %v1161_v51 = vmul.f32 %v2470_v3, %v1101_v56  ;;  %v1300_v1 = vmax.f32 %v1284_v54, 0.0 }
 0x1fa   :  { %v1145_v4 = vpop.permute.xlu1 %1144 }
 0x1fb   :  { %v1172_v25 = vmul.f32 %v2470_v3, %v1145_v4  ;;  %v1177_v62 = vadd.f32 %v1161_v51, %v2465_v33  ;;  %v1264_v33 = vmul.f32 %v2532_v45, %v1213_v11 }
 0x1fd   :  { %v2546_v34 = vadd.f32 %v1172_v25, %v2450_v22  ;;  %v1280_v17 = vadd.f32 %v1264_v33, %v1180_v47 }
 0x1fe   :  { %v1153_v5 = vpop.permute.xlu1 %1152 }
 0x1ff   :  { %v1174_v28 = vmul.f32 %v2470_v3, %v1153_v5  ;;  %v1296_v59 = vmax.f32 %v1280_v17, 0.0 }
 0x201   :  { %v2552_v60 = vadd.f32 %v1174_v28, %v2455_v49 }
 0x203   :  { %v1197_v16 = vpop.permute.xlu1 %1196 }
 0x204   :  { %v1260_v22 = vmul.f32 %v2532_v45, %v1197_v16 }
 0x206   :  { %v1276_v20 = vadd.f32 %v1260_v22, %v1176_v52 }
 0x207   :  { %v1201_v40 = vpop.permute.xlu1 %1200 }
 0x208   :  { %v1292_v49 = vmax.f32 %v1276_v20, 0.0  ;;  %v1261_v44 = vmul.f32 %v2532_v45, %v1201_v40 }
 0x20a   :  { %v1277_v42 = vadd.f32 %v1261_v44, %v1177_v62  ;;  %1308 = vxpose.xlu1.b32.cont [2/16] %v1292_v49, 128 }
 0x20b   :  { %v1209_v61 = vpop.permute.xlu1 %1208 }
 0x20c   :  { %v1293_v50 = vmax.f32 %v1277_v42, 0.0  ;;  %v1263_v2 = vmul.f32 %v2532_v45, %v1209_v61 }
 0x20e   :  { %1309 = vxpose.xlu1.b32.cont [3/16] %v1293_v50, 128  ;;  %v1279_v7 = vadd.f32 %v1263_v2, %v2479_v53  ;;  %v1282_v53 = vadd.f32 %v1266_v15, %v1182_v26 }
 0x20f   :  { %v1217_v10 = vpop.permute.xlu1 %1216 }
 0x210   :  { %v1295_v14 = vmax.f32 %v1279_v7, 0.0  ;;  %v1265_v57 = vmul.f32 %v2532_v45, %v1217_v10  ;;  %v1298_v3 = vmax.f32 %v1282_v53, 0.0 }
 0x212   :  { %1310 = vxpose.xlu1.b32.cont [4/16] %v1294_v43, 128  ;;  %v1281_v41 = vadd.f32 %v1265_v57, %v2495_v23  ;;  %v1237_v23 = vpop.permute.xlu0 %1236 }
 0x213   :  { %v1225_v37 = vpop.permute.xlu1 %1224  ;;  %v1270_v29 = vmul.f32 %v2532_v45, %v1237_v23 }
 0x214   :  { %v1297_v0 = vmax.f32 %v1281_v41, 0.0  ;;  %v1267_v56 = vmul.f32 %v2532_v45, %v1225_v37 }
 0x215   :  { %v1286_v25 = vadd.f32 %v1270_v29, %v2542_v32 }
 0x216   :  { %1311 = vxpose.xlu1.b32.cont [5/16] %v1295_v14, 128  ;;  %v1283_v19 = vadd.f32 %v1267_v56, %v2505_v55  ;;  %v1245_v28 = vpop.permute.xlu0 %1244 }
 0x217   :  { %v1233_v63 = vpop.permute.xlu1 %1232  ;;  %v1302_v27 = vmax.f32 %v1286_v25, 0.0  ;;  %v1272_v8 = vmul.f32 %v2532_v45, %v1245_v28 }
 0x218   :  { %v1299_v58 = vmax.f32 %v1283_v19, 0.0  ;;  %v1269_v21 = vmul.f32 %v2532_v45, %v1233_v63 }
 0x219   :  { %v1288_v51 = vadd.f32 %v1272_v8, %v2546_v34 }
 0x21a   :  { %1312 = vxpose.xlu1.b32.cont [6/16] %v1296_v59, 128  ;;  %v1285_v31 = vadd.f32 %v1269_v21, %v2514_v48  ;;  %v1253_v13 = vpop.permute.xlu0 %1252 }
 0x21b   :  { %v1241_v4 = vpop.permute.xlu1 %1240  ;;  %v1304_v32 = vmax.f32 %v1288_v51, 0.0  ;;  %v1274_v22 = vmul.f32 %v2532_v45, %v1253_v13 }
 0x21c   :  { %v1301_v5 = vmax.f32 %v1285_v31, 0.0  ;;  %v1271_v55 = vmul.f32 %v2532_v45, %v1241_v4 }
 0x21d   :  { %v1290_v6 = vadd.f32 %v1274_v22, %v2552_v60 }
 0x21e   :  { %1313 = vxpose.xlu1.b32.cont [7/16] %v1297_v0, 128  ;;  %v1287_v16 = vadd.f32 %v1271_v55, %v2523_v9  ;;  %v1342_v62 = vpop.permute.xlu0 %1341 }
 0x21f   :  { %v1249_v52 = vpop.permute.xlu1 %1248  ;;  %v1306_v9 = vmax.f32 %v1290_v6, 0.0 }
 0x220   :  { %v1303_v12 = vmax.f32 %v1287_v16, 0.0  ;;  %v1273_v48 = vmul.f32 %v2532_v45, %v1249_v52 }
 0x222   :  { %1314 = vxpose.xlu1.b32.cont [8/16] %v1298_v3, 128  ;;  %v1289_v20 = vadd.f32 %v1273_v48, %v2534_v24  ;;  %v1347_v39 = vpop.permute.xlu0 %1346 }
 0x224   :  { %v1305_v40 = vmax.f32 %v1289_v20, 0.0 }
 0x226   :  { %1315 = vxpose.xlu1.b32.cont [9/16] %v1299_v58, 128  ;;  %v1352_v34 = vpop.permute.xlu0 %1351 }
 0x22a   :  { %1316 = vxpose.xlu1.b32.cont [10/16] %v1300_v1, 128  ;;  %v1357_v49 = vpop.permute.xlu0 %1356 }
 0x22e   :  { %1317 = vxpose.xlu1.b32.cont [11/16] %v1301_v5, 128  ;;  %v1362_v44 = vpop.permute.xlu0 %1361 }
 0x232   :  { %1318 = vxpose.xlu1.b32.cont [12/16] %v1302_v27, 128  ;;  %v1367_v42 = vpop.permute.xlu0 %1366 }
 0x236   :  { %1319 = vxpose.xlu1.b32.cont [13/16] %v1303_v12, 128  ;;  %v1372_v30 = vpop.permute.xlu0 %1371 }
 0x23a   :  { %1320 = vxpose.xlu1.b32.cont [14/16] %v1304_v32, 128  ;;  %v1377_v45 = vpop.permute.xlu0 %1376 }
 0x23e   :  { %1321 = vxpose.xlu1.b32.cont [15/16] %v1305_v40, 128  ;;  %v1382_v11 = vpop.permute.xlu0 %1381  ;;  %v1461_v40 = vlaneseq }
 0x242   :  { %1322 = vxpose.xlu1.b32.end [16/16] %v1306_v9, 128  ;;  %v1387_v60 = vpop.permute.xlu0 %1386 }
 0x246   :  { %v1392_v7 = vpop.permute.xlu0 %1391 }
 0x24a   :  { %v1397_v59 = vpop.permute.xlu0 %1396 }
 0x24e   :  { %v1402_v3 = vpop.permute.xlu0 %1401 }
 0x252   :  { %v1407_v1 = vpop.permute.xlu0 %1406 }
 0x256   :  { %v1412_v8 = vpop.permute.xlu0 %1411 }
 0x25a   :  { %v1417_v32 = vpop.permute.xlu0 %1416 }
 0x286   :  { %v1323_v61 = vpop.trf.xlu1 }
 0x287   :  { %v1419_v46 = vmul.f32 %v1342_v62, %v1323_v61  ;;  %v1459_v61 = vpop.permute.xlu0 %1458 }
 0x28a   :  { %v1324_v38 = vpop.trf.xlu1 }
 0x28b   :  { %v1420_v10 = vmul.f32 %v1347_v39, %v1324_v38  ;;  %v1462_v39 = vshrl.u32 %v1461_v40, 7 }
 0x28d   :  { %v1435_v57 = vadd.f32 %v1420_v10, %v1419_v46 }
 0x28e   :  { %v1325_v50 = vpop.trf.xlu1 }
 0x28f   :  { %v1421_v14 = vmul.f32 %v1352_v34, %v1325_v50 }
 0x291   :  { %v1436_v15 = vadd.f32 %v1435_v57, %v1421_v14 }
 0x292   :  { %v1326_v2 = vpop.trf.xlu1 }
 0x293   :  { %v1422_v35 = vmul.f32 %v1357_v49, %v1326_v2 }
 0x295   :  { %v1437_v37 = vadd.f32 %v1436_v15, %v1422_v35 }
 0x296   :  { %v1327_v24 = vpop.trf.xlu1 }
 0x297   :  { %v1423_v41 = vmul.f32 %v1362_v44, %v1327_v24  ;;  %v1463_v44 = vsub.s32 0, %v1462_v39 }
 0x299   :  { %v1438_v56 = vadd.f32 %v1437_v37, %v1423_v41 }
 0x29a   :  { %v1328_v43 = vpop.trf.xlu1 }
 0x29b   :  { %v1424_v53 = vmul.f32 %v1367_v42, %v1328_v43 }
 0x29d   :  { %v1439_v36 = vadd.f32 %v1438_v56, %v1424_v53 }
 0x29e   :  { %v1329_v47 = vpop.trf.xlu1 }
 0x29f   :  { %v1425_v18 = vmul.f32 %v1372_v30, %v1329_v47  ;;  %v1464_v30 = vrot.slane %v1459_v61, %v1463_v44 }
 0x2a1   :  { %v1440_v54 = vadd.f32 %v1439_v36, %v1425_v18 }
 0x2a2   :  { %v1330_v33 = vpop.trf.xlu1 }
 0x2a3   :  { %v1426_v19 = vmul.f32 %v1377_v45, %v1330_v33 }
 0x2a5   :  { %v1441_v21 = vadd.f32 %v1440_v54, %v1426_v19 }
 0x2a6   :  { %v1331_v17 = vpop.trf.xlu1 }
 0x2a7   :  { %v1427_v58 = vmul.f32 %v1382_v11, %v1331_v17 }
 0x2a9   :  { %v1442_v31 = vadd.f32 %v1441_v21, %v1427_v58 }
 0x2aa   :  { %v1332_v26 = vpop.trf.xlu1 }
 0x2ab   :  { %v1428_v23 = vmul.f32 %v1387_v60, %v1332_v26 }
 0x2ad   :  { %v1443_v25 = vadd.f32 %v1442_v31, %v1428_v23 }
 0x2ae   :  { %v1333_v0 = vpop.trf.xlu1 }
 0x2af   :  { %v1429_v4 = vmul.f32 %v1392_v7, %v1333_v0 }
 0x2b1   :  { %v1444_v28 = vadd.f32 %v1443_v25, %v1429_v4 }
 0x2b2   :  { %v1334_v63 = vpop.trf.xlu1 }
 0x2b3   :  { %v1430_v5 = vmul.f32 %v1397_v59, %v1334_v63 }
 0x2b5   :  { %v1445_v16 = vadd.f32 %v1444_v28, %v1430_v5 }
 0x2b6   :  { %v1335_v29 = vpop.trf.xlu1 }
 0x2b7   :  { %v1431_v27 = vmul.f32 %v1402_v3, %v1335_v29 }
 0x2b9   :  { %v1446_v12 = vadd.f32 %v1445_v16, %v1431_v27 }
 0x2ba   :  { %v1336_v55 = vpop.trf.xlu1 }
 0x2bb   :  { %v1432_v52 = vmul.f32 %v1407_v1, %v1336_v55 }
 0x2bd   :  { %v1447_v13 = vadd.f32 %v1446_v12, %v1432_v52 }
 0x2be   :  { %v1337_v51 = vpop.trf.xlu1 }
 0x2bf   :  { %v1433_v48 = vmul.f32 %v1412_v8, %v1337_v51 }
 0x2c1   :  { %v1448_v20 = vadd.f32 %v1447_v13, %v1433_v48 }
 0x2c2   :  { %v1338_v22 = vpop.trf.xlu1 }
 0x2c3   :  { %v1434_v6 = vmul.f32 %v1417_v32, %v1338_v22 }
 0x2c5   :  { %v1449_v9 = vadd.f32 %v1448_v20, %v1434_v6 }
 0x2c7   :  { %v1450_v62 = vrot.slane %v1449_v9, 4 }
 0x2c9   :  { %v1451_v34 = vadd.f32 %v1450_v62, %v1449_v9 }
 0x2cb   :  { %v1452_v49 = vrot.slane %v1451_v34, 2 }
 0x2cd   :  { %v1453_v42 = vadd.f32 %v1452_v49, %v1451_v34 }
 0x2cf   :  { %v1454_v38 = vrot.slane %v1453_v42, 1 }
 0x2d1   :  { %v1455_v50 = vadd.f32 %v1454_v38, %v1453_v42 }
 0x2d3   :  { %v1465_v45 = vadd.f32 %v1464_v30, %v1455_v50 }
 0x2d5   :  { %1466 = vst [vmem:[#allocation3] sm:$0x1] %v1465_v45 }
 0x2d6   :  { %1555 = shalt.err (!%p1552_p4)
}
 0x2d7   :  { %s1556_s0 = scalar_lea.hbm %s2604_s5, 16 }
 0x2d8   :  { %p1557_p5 = scmp.ne.s32.totalorder %s2604_s5, %s1556_s0  ;;  %p1560_p6 = scmp.lt.u32.totalorder %s1556_s0, %s2604_s5 }
 0x2da   :  { %p1562_p7 = pnand %p1560_p6, %p1557_p5 }
 0x2dc   :  { %1565 = shalt.err (!%p1562_p7)
}
 0x2dd   :  { %1476 = dma.vmem_to_hbm [thread:$0]  %s1474_s26, 16, %s2604_s5, [#allocation4]  }
 0x2de   :  { %1566 = dma.done.wait [#allocation4], 16  }
 0x2df   :  { %1567 = vsyncadd [#allocation4], 4294967280 }
 0x2e0   :  { %1480 = vsyncpa [#allocation4], 1 }

</bundles_post_ra>
